<compile_context>
chip_gen: v7x
topology: tpu7x:2x2x1
jax: 0.10.0
libtpu: 0.0.40
codegen_flags: <defaults>
</compile_context>

<pallas_src>
import jax
import jax.numpy as jnp
from jax.experimental import pallas as pl
from jax.experimental.pallas import tpu as pltpu

D_MODEL = 32
NUM_HEAD = 8
HEAD_DIM = D_MODEL // NUM_HEAD
D_FF = 4 * D_MODEL
LN_EPS = 1e-5


def _layernorm(x, gamma, beta):
    mean = jnp.mean(x, axis=-1, keepdims=True)
    var = jnp.mean((x - mean) ** 2, axis=-1, keepdims=True)
    return (x - mean) * jax.lax.rsqrt(var + LN_EPS) * gamma + beta


def encoder_layer_kernel(x_ref, g1_ref, b1_ref, wqkv_ref, bqkv_ref,
                         wo_ref, bo_ref, gf_ref, bf_ref,
                         w1_ref, b1f_ref, w2_ref, b2f_ref, o_ref):
    tb, s, d = x_ref.shape
    rows = tb * s

    # All TB batch elements are processed as one (TB*S, D) slab.
    x = x_ref[...].astype(jnp.float32).reshape(rows, d)

    # ---- norm1 (pre-attention LayerNorm) ----
    xn = _layernorm(x, g1_ref[...], b1_ref[...])

    # ---- multi-head self attention (q = k = v = xn) ----
    # wqkv_ref is pre-transposed to (D, 3D): qkv = xn @ Wqkv^T + b
    qkv = jnp.dot(xn, wqkv_ref[...], preferred_element_type=jnp.float32) + bqkv_ref[...]

    scale = 1.0 / (HEAD_DIM ** 0.5)
    q = qkv[:, :D_MODEL] * scale                 # fold scale into q once
    k = qkv[:, D_MODEL:2 * D_MODEL]
    v = qkv[:, 2 * D_MODEL:]

    q3 = q.reshape(tb, s, D_MODEL)
    k3 = k.reshape(tb, s, D_MODEL)
    v3 = v.reshape(tb, s, D_MODEL)

    wo = wo_ref[...]                             # (D, D), pre-transposed Wo^T
    attn = jnp.zeros((rows, D_MODEL), jnp.float32)
    for h in range(NUM_HEAD):                    # static unroll over heads,
        lo = h * HEAD_DIM                        # each iteration TB-batched
        qh = q3[:, :, lo:lo + HEAD_DIM]
        kh = k3[:, :, lo:lo + HEAD_DIM]
        vh = v3[:, :, lo:lo + HEAD_DIM]
        # batched contraction over head_dim -> no explicit kh.T transpose
        sc = jnp.einsum('bqd,bkd->bqk', qh, kh,
                        preferred_element_type=jnp.float32)      # (TB, S, S)
        sc = sc - jnp.max(sc, axis=-1, keepdims=True)
        p = jnp.exp(sc)
        p = p * pl.reciprocal(jnp.sum(p, axis=-1, keepdims=True), approx=True)
        oh = jnp.einsum('bqk,bkd->bqd', p, vh,
                        preferred_element_type=jnp.float32)      # (TB, S, Hd)
        # fuse head recombination into the out-projection (no concat)
        attn = attn + jnp.dot(oh.reshape(rows, HEAD_DIM),
                              wo[lo:lo + HEAD_DIM, :],
                              preferred_element_type=jnp.float32)

    # out-proj bias + residual (dropout = identity)
    x1 = x + attn + bo_ref[...]

    # ---- FFN, norm_first=True, activation = relu ----
    xn2 = _layernorm(x1, gf_ref[...], bf_ref[...])
    h1 = jnp.dot(xn2, w1_ref[...], preferred_element_type=jnp.float32) + b1f_ref[...]
    h1 = jnp.maximum(h1, 0.0)
    h2 = jnp.dot(h1, w2_ref[...], preferred_element_type=jnp.float32) + b2f_ref[...]

    o_ref[...] = (x1 + h2).reshape(tb, s, d).astype(o_ref.dtype)


def init_params(key):
    ks = jax.random.split(key, 8)
    s = 0.05
    return {
        # nn.MultiheadAttention: in_proj (3D, D) + bias, out_proj (D, D) + bias
        "wqkv": jax.random.normal(ks[0], (3 * D_MODEL, D_MODEL), jnp.float32) * s,
        "bqkv": jax.random.normal(ks[1], (3 * D_MODEL,), jnp.float32) * s,
        "wo":   jax.random.normal(ks[2], (D_MODEL, D_MODEL), jnp.float32) * s,
        "bo":   jax.random.normal(ks[3], (D_MODEL,), jnp.float32) * s,
        # norm1
        "g1": jnp.ones((D_MODEL,), jnp.float32),
        "b1": jnp.zeros((D_MODEL,), jnp.float32),
        # FFN: lin1 (D_FF, D) + bias, lin2 (D, D_FF) + bias, norm
        "w1":  jax.random.normal(ks[4], (D_FF, D_MODEL), jnp.float32) * s,
        "b1f": jax.random.normal(ks[5], (D_FF,), jnp.float32) * s,
        "w2":  jax.random.normal(ks[6], (D_MODEL, D_FF), jnp.float32) * s,
        "b2f": jax.random.normal(ks[7], (D_MODEL,), jnp.float32) * s,
        "gf": jnp.ones((D_MODEL,), jnp.float32),
        "bf": jnp.zeros((D_MODEL,), jnp.float32),
    }


@jax.jit
def encoder_layer(x, params):
    B, S, D = x.shape
    assert D == D_MODEL

    # Pack up to 64 batch elements per grid step (TB*S rows per slab) so the
    # per-step pipeline overhead is amortized; pad B if not divisible.
    TB = min(B, 64)
    B_pad = ((B + TB - 1) // TB) * TB
    x_p = jnp.pad(x, ((0, B_pad - B), (0, 0), (0, 0))) if B_pad != B else x

    # Pre-transpose Linear weights so the kernel does x @ W (lane-dense RHS);
    # biases/scales become (1, N) 2-D slabs.
    wqkv_t = params["wqkv"].T                      # (D, 3D)
    wo_t = params["wo"].T                          # (D, D)
    w1_t = params["w1"].T                          # (D, D_FF)
    w2_t = params["w2"].T                          # (D_FF, D)
    bqkv = params["bqkv"].reshape(1, -1)
    bo = params["bo"].reshape(1, -1)
    b1f = params["b1f"].reshape(1, -1)
    b2f = params["b2f"].reshape(1, -1)
    g1 = params["g1"].reshape(1, -1)
    b1 = params["b1"].reshape(1, -1)
    gf = params["gf"].reshape(1, -1)
    bf = params["bf"].reshape(1, -1)

    def full2d(arr):
        return pl.BlockSpec(arr.shape, lambda b: (0, 0))

    out = pl.pallas_call(
        encoder_layer_kernel,
        out_shape=jax.ShapeDtypeStruct((B_pad, S, D), x.dtype),
        grid_spec=pltpu.PrefetchScalarGridSpec(
            num_scalar_prefetch=0,
            grid=(B_pad // TB,),
            in_specs=[
                pl.BlockSpec((TB, S, D), lambda b: (b, 0, 0)),   # x
                full2d(g1), full2d(b1),                          # norm1
                full2d(wqkv_t), full2d(bqkv),                    # attention in-proj
                full2d(wo_t), full2d(bo),                        # attention out-proj
                full2d(gf), full2d(bf),                          # ffn norm
                full2d(w1_t), full2d(b1f),                       # ffn lin1
                full2d(w2_t), full2d(b2f),                       # ffn lin2
            ],
            out_specs=pl.BlockSpec((TB, S, D), lambda b: (b, 0, 0)),
        ),
        compiler_params=pltpu.CompilerParams(
            dimension_semantics=("parallel",)),      # batch axis is independent
    )(x_p, g1, b1, wqkv_t, bqkv, wo_t, bo, gf, bf, w1_t, b1f, w2_t, b2f)

    return out[:B] if B_pad != B else out


def encoder_layer_ref(x, params):
    """Pure-JAX reference mirroring the PyTorch forward (eval mode)."""
    def ln(z, g, b):
        m = jnp.mean(z, -1, keepdims=True)
        v = jnp.mean((z - m) ** 2, -1, keepdims=True)
        return (z - m) / jnp.sqrt(v + LN_EPS) * g + b

    xn = ln(x, params["g1"], params["b1"])
    qkv = xn @ params["wqkv"].T + params["bqkv"]
    q, k, v = jnp.split(qkv, 3, axis=-1)
    B, S, D = x.shape

    def split_heads(t):
        return t.reshape(B, S, NUM_HEAD, HEAD_DIM).transpose(0, 2, 1, 3)

    qh, kh, vh = split_heads(q), split_heads(k), split_heads(v)
    s = jnp.einsum("bhqd,bhkd->bhqk", qh, kh) / jnp.sqrt(HEAD_DIM)
    p = jax.nn.softmax(s, axis=-1)
    o = jnp.einsum("bhqk,bhkd->bhqd", p, vh).transpose(0, 2, 1, 3).reshape(B, S, D)
    o = o @ params["wo"].T + params["bo"]
    x1 = x + o
    xn2 = ln(x1, params["gf"], params["bf"])
    h1 = jnp.maximum(xn2 @ params["w1"].T + params["b1f"], 0.0)
    h2 = h1 @ params["w2"].T + params["b2f"]
    return x1 + h2


if __name__ == "__main__":
    key = jax.random.PRNGKey(0)
    kx, kp = jax.random.split(key)

    B, S = 2, 8
    x = jax.random.normal(kx, (B, S, D_MODEL), jnp.float32)
    params = init_params(kp)

    out = encoder_layer(x, params)
    out = jax.block_until_ready(out)

    ref = encoder_layer_ref(x, params)
    assert out.shape == (B, S, D_MODEL)
    # slightly relaxed tolerance for pl.reciprocal(approx=True) in the softmax
    assert jnp.allclose(out, ref, atol=2e-4, rtol=2e-4), "mismatch vs reference"

    print("KERNEL_OK")
</pallas_src>

<mosaic_0001>
module attributes {stable_mosaic.version = 11 : i64} {
  func.func @encoder_layer_kernel(%arg0: i32, %arg1: memref<2x8x32xf32, #tpu.memory_space<vmem>>, %arg2: memref<1x32xf32, #tpu.memory_space<vmem>>, %arg3: memref<1x32xf32, #tpu.memory_space<vmem>>, %arg4: memref<32x96xf32, #tpu.memory_space<vmem>>, %arg5: memref<1x96xf32, #tpu.memory_space<vmem>>, %arg6: memref<32x32xf32, #tpu.memory_space<vmem>>, %arg7: memref<1x32xf32, #tpu.memory_space<vmem>>, %arg8: memref<1x32xf32, #tpu.memory_space<vmem>>, %arg9: memref<1x32xf32, #tpu.memory_space<vmem>>, %arg10: memref<32x128xf32, #tpu.memory_space<vmem>>, %arg11: memref<1x128xf32, #tpu.memory_space<vmem>>, %arg12: memref<128x32xf32, #tpu.memory_space<vmem>>, %arg13: memref<1x32xf32, #tpu.memory_space<vmem>>, %arg14: memref<2x8x32xf32, #tpu.memory_space<vmem>>) attributes {dimension_semantics = [#tpu.dimension_semantics<parallel>], iteration_bounds = array<i64: 1>, scalar_prefetch = 0 : i64, scratch_operands = 0 : i64, tpu.core_type = #tpu.core_type<tc>, window_params = [{transform_indices = @transform_0, window_bounds = array<i64: 2, 8, 32>}, {pipeline_mode = #tpu.pipeline_mode<synchronous>, transform_indices = @transform_1, window_bounds = array<i64: 1, 32>}, {pipeline_mode = #tpu.pipeline_mode<synchronous>, transform_indices = @transform_2, window_bounds = array<i64: 1, 32>}, {pipeline_mode = #tpu.pipeline_mode<synchronous>, transform_indices = @transform_3, window_bounds = array<i64: 32, 96>}, {pipeline_mode = #tpu.pipeline_mode<synchronous>, transform_indices = @transform_4, window_bounds = array<i64: 1, 96>}, {pipeline_mode = #tpu.pipeline_mode<synchronous>, transform_indices = @transform_5, window_bounds = array<i64: 32, 32>}, {pipeline_mode = #tpu.pipeline_mode<synchronous>, transform_indices = @transform_6, window_bounds = array<i64: 1, 32>}, {pipeline_mode = #tpu.pipeline_mode<synchronous>, transform_indices = @transform_7, window_bounds = array<i64: 1, 32>}, {pipeline_mode = #tpu.pipeline_mode<synchronous>, transform_indices = @transform_8, window_bounds = array<i64: 1, 32>}, {pipeline_mode = #tpu.pipeline_mode<synchronous>, transform_indices = @transform_9, window_bounds = array<i64: 32, 128>}, {pipeline_mode = #tpu.pipeline_mode<synchronous>, transform_indices = @transform_10, window_bounds = array<i64: 1, 128>}, {pipeline_mode = #tpu.pipeline_mode<synchronous>, transform_indices = @transform_11, window_bounds = array<i64: 128, 32>}, {pipeline_mode = #tpu.pipeline_mode<synchronous>, transform_indices = @transform_12, window_bounds = array<i64: 1, 32>}, {transform_indices = @transform_13, window_bounds = array<i64: 2, 8, 32>}]} {
    %c0 = arith.constant 0 : index
    %c0_0 = arith.constant 0 : index
    %c0_1 = arith.constant 0 : index
    %0 = vector.load %arg1[%c0, %c0_0, %c0_1] : memref<2x8x32xf32, #tpu.memory_space<vmem>>, vector<2x8x32xf32>
    %1 = vector.shape_cast %0 : vector<2x8x32xf32> to vector<16x32xf32>
    %c0_2 = arith.constant 0 : index
    %c0_3 = arith.constant 0 : index
    %2 = vector.load %arg2[%c0_2, %c0_3] : memref<1x32xf32, #tpu.memory_space<vmem>>, vector<1x32xf32>
    %c0_4 = arith.constant 0 : index
    %c0_5 = arith.constant 0 : index
    %3 = vector.load %arg3[%c0_4, %c0_5] : memref<1x32xf32, #tpu.memory_space<vmem>>, vector<1x32xf32>
    %cst = arith.constant dense<0.000000e+00> : vector<16xf32>
    %4 = vector.multi_reduction <add>, %1, %cst [1] : vector<16x32xf32> to vector<16xf32>
    %5 = vector.shape_cast %4 : vector<16xf32> to vector<16x1xf32>
    %cst_6 = arith.constant 3.200000e+01 : f32
    %6 = vector.broadcast %cst_6 : f32 to vector<16x1xf32>
    %7 = arith.divf %5, %6 : vector<16x1xf32>
    %8 = vector.broadcast %7 : vector<16x1xf32> to vector<16x32xf32>
    %9 = arith.subf %1, %8 : vector<16x32xf32>
    %10 = arith.mulf %9, %9 : vector<16x32xf32>
    %cst_7 = arith.constant dense<0.000000e+00> : vector<16xf32>
    %11 = vector.multi_reduction <add>, %10, %cst_7 [1] : vector<16x32xf32> to vector<16xf32>
    %12 = vector.shape_cast %11 : vector<16xf32> to vector<16x1xf32>
    %cst_8 = arith.constant 3.200000e+01 : f32
    %13 = vector.broadcast %cst_8 : f32 to vector<16x1xf32>
    %14 = arith.divf %12, %13 : vector<16x1xf32>
    %15 = vector.broadcast %7 : vector<16x1xf32> to vector<16x32xf32>
    %16 = arith.subf %1, %15 : vector<16x32xf32>
    %cst_9 = arith.constant 9.99999974E-6 : f32
    %17 = vector.broadcast %cst_9 : f32 to vector<16x1xf32>
    %18 = arith.addf %14, %17 : vector<16x1xf32>
    %19 = math.rsqrt %18 : vector<16x1xf32>
    %20 = vector.broadcast %19 : vector<16x1xf32> to vector<16x32xf32>
    %21 = arith.mulf %16, %20 : vector<16x32xf32>
    %22 = vector.broadcast %2 : vector<1x32xf32> to vector<16x32xf32>
    %23 = arith.mulf %21, %22 : vector<16x32xf32>
    %24 = vector.broadcast %3 : vector<1x32xf32> to vector<16x32xf32>
    %25 = arith.addf %23, %24 : vector<16x32xf32>
    %c0_10 = arith.constant 0 : index
    %c0_11 = arith.constant 0 : index
    %26 = vector.load %arg4[%c0_10, %c0_11] : memref<32x96xf32, #tpu.memory_space<vmem>>, vector<32x96xf32>
    %cst_12 = arith.constant dense<0.000000e+00> : vector<16x96xf32>
    %27 = tpu.matmul %25, %26, %cst_12 {dimension_numbers = #tpu.dot_dimension_numbers<[1], [0], [0], [1], [0, 0, 1, 1], [], []>} : vector<16x32xf32>, vector<32x96xf32>, vector<16x96xf32> -> vector<16x96xf32>
    %c0_13 = arith.constant 0 : index
    %c0_14 = arith.constant 0 : index
    %28 = vector.load %arg5[%c0_13, %c0_14] : memref<1x96xf32, #tpu.memory_space<vmem>>, vector<1x96xf32>
    %29 = vector.broadcast %28 : vector<1x96xf32> to vector<16x96xf32>
    %30 = arith.addf %27, %29 : vector<16x96xf32>
    %31 = vector.extract_strided_slice %30 {offsets = [0, 0], sizes = [16, 32], strides = [1, 1]} : vector<16x96xf32> to vector<16x32xf32>
    %cst_15 = arith.constant 5.000000e-01 : f32
    %32 = vector.broadcast %cst_15 : f32 to vector<16x32xf32>
    %33 = arith.mulf %31, %32 : vector<16x32xf32>
    %34 = vector.extract_strided_slice %30 {offsets = [0, 32], sizes = [16, 32], strides = [1, 1]} : vector<16x96xf32> to vector<16x32xf32>
    %35 = vector.extract_strided_slice %30 {offsets = [0, 64], sizes = [16, 32], strides = [1, 1]} : vector<16x96xf32> to vector<16x32xf32>
    %36 = vector.shape_cast %33 : vector<16x32xf32> to vector<2x8x32xf32>
    %37 = vector.shape_cast %34 : vector<16x32xf32> to vector<2x8x32xf32>
    %38 = vector.shape_cast %35 : vector<16x32xf32> to vector<2x8x32xf32>
    %c0_16 = arith.constant 0 : index
    %c0_17 = arith.constant 0 : index
    %39 = vector.load %arg6[%c0_16, %c0_17] : memref<32x32xf32, #tpu.memory_space<vmem>>, vector<32x32xf32>
    %cst_18 = arith.constant 0.000000e+00 : f32
    %40 = vector.broadcast %cst_18 : f32 to vector<16x32xf32>
    %41 = vector.extract_strided_slice %36 {offsets = [0, 0, 0], sizes = [2, 8, 4], strides = [1, 1, 1]} : vector<2x8x32xf32> to vector<2x8x4xf32>
    %42 = vector.extract_strided_slice %37 {offsets = [0, 0, 0], sizes = [2, 8, 4], strides = [1, 1, 1]} : vector<2x8x32xf32> to vector<2x8x4xf32>
    %43 = vector.extract_strided_slice %38 {offsets = [0, 0, 0], sizes = [2, 8, 4], strides = [1, 1, 1]} : vector<2x8x32xf32> to vector<2x8x4xf32>
    "tpu.trace_start"() <{level = 10 : i32, message = "bqd,bkd->bqk"}> : () -> ()
    %cst_19 = arith.constant dense<0.000000e+00> : vector<2x8x8xf32>
    %44 = tpu.matmul %41, %42, %cst_19 {dimension_numbers = #tpu.dot_dimension_numbers<[2], [2], [1], [1], [0, 0, 0, 1, 1, 1], [0], [0]>} : vector<2x8x4xf32>, vector<2x8x4xf32>, vector<2x8x8xf32> -> vector<2x8x8xf32>
    "tpu.trace_stop"() : () -> ()
    %cst_20 = arith.constant dense<0xFF800000> : vector<2x8xf32>
    %45 = vector.multi_reduction <maximumf>, %44, %cst_20 [2] : vector<2x8x8xf32> to vector<2x8xf32>
    %46 = vector.shape_cast %45 : vector<2x8xf32> to vector<2x8x1xf32>
    %47 = vector.broadcast %46 : vector<2x8x1xf32> to vector<2x8x8xf32>
    %48 = arith.subf %44, %47 : vector<2x8x8xf32>
    %49 = math.exp %48 : vector<2x8x8xf32>
    %cst_21 = arith.constant dense<0.000000e+00> : vector<2x8xf32>
    %50 = vector.multi_reduction <add>, %49, %cst_21 [2] : vector<2x8x8xf32> to vector<2x8xf32>
    %51 = vector.shape_cast %50 : vector<2x8xf32> to vector<2x8x1xf32>
    %52 = tpu.reciprocal %51 {approx = true} : vector<2x8x1xf32> -> vector<2x8x1xf32>
    %53 = vector.broadcast %52 : vector<2x8x1xf32> to vector<2x8x8xf32>
    %54 = arith.mulf %49, %53 : vector<2x8x8xf32>
    "tpu.trace_start"() <{level = 10 : i32, message = "bqk,bkd->bqd"}> : () -> ()
    %cst_22 = arith.constant dense<0.000000e+00> : vector<2x8x4xf32>
    %55 = tpu.matmul %54, %43, %cst_22 {dimension_numbers = #tpu.dot_dimension_numbers<[2], [1], [1], [2], [0, 0, 0, 1, 1, 2], [0], [0]>} : vector<2x8x8xf32>, vector<2x8x4xf32>, vector<2x8x4xf32> -> vector<2x8x4xf32>
    "tpu.trace_stop"() : () -> ()
    %56 = vector.shape_cast %55 : vector<2x8x4xf32> to vector<16x4xf32>
    %57 = vector.extract_strided_slice %39 {offsets = [0, 0], sizes = [4, 32], strides = [1, 1]} : vector<32x32xf32> to vector<4x32xf32>
    %cst_23 = arith.constant dense<0.000000e+00> : vector<16x32xf32>
    %58 = tpu.matmul %56, %57, %cst_23 {dimension_numbers = #tpu.dot_dimension_numbers<[1], [0], [0], [1], [0, 0, 1, 1], [], []>} : vector<16x4xf32>, vector<4x32xf32>, vector<16x32xf32> -> vector<16x32xf32>
    %59 = arith.addf %40, %58 : vector<16x32xf32>
    %60 = vector.extract_strided_slice %36 {offsets = [0, 0, 4], sizes = [2, 8, 4], strides = [1, 1, 1]} : vector<2x8x32xf32> to vector<2x8x4xf32>
    %61 = vector.extract_strided_slice %37 {offsets = [0, 0, 4], sizes = [2, 8, 4], strides = [1, 1, 1]} : vector<2x8x32xf32> to vector<2x8x4xf32>
    %62 = vector.extract_strided_slice %38 {offsets = [0, 0, 4], sizes = [2, 8, 4], strides = [1, 1, 1]} : vector<2x8x32xf32> to vector<2x8x4xf32>
    "tpu.trace_start"() <{level = 10 : i32, message = "bqd,bkd->bqk"}> : () -> ()
    %cst_24 = arith.constant dense<0.000000e+00> : vector<2x8x8xf32>
    %63 = tpu.matmul %60, %61, %cst_24 {dimension_numbers = #tpu.dot_dimension_numbers<[2], [2], [1], [1], [0, 0, 0, 1, 1, 1], [0], [0]>} : vector<2x8x4xf32>, vector<2x8x4xf32>, vector<2x8x8xf32> -> vector<2x8x8xf32>
    "tpu.trace_stop"() : () -> ()
    %cst_25 = arith.constant dense<0xFF800000> : vector<2x8xf32>
    %64 = vector.multi_reduction <maximumf>, %63, %cst_25 [2] : vector<2x8x8xf32> to vector<2x8xf32>
    %65 = vector.shape_cast %64 : vector<2x8xf32> to vector<2x8x1xf32>
    %66 = vector.broadcast %65 : vector<2x8x1xf32> to vector<2x8x8xf32>
    %67 = arith.subf %63, %66 : vector<2x8x8xf32>
    %68 = math.exp %67 : vector<2x8x8xf32>
    %cst_26 = arith.constant dense<0.000000e+00> : vector<2x8xf32>
    %69 = vector.multi_reduction <add>, %68, %cst_26 [2] : vector<2x8x8xf32> to vector<2x8xf32>
    %70 = vector.shape_cast %69 : vector<2x8xf32> to vector<2x8x1xf32>
    %71 = tpu.reciprocal %70 {approx = true} : vector<2x8x1xf32> -> vector<2x8x1xf32>
    %72 = vector.broadcast %71 : vector<2x8x1xf32> to vector<2x8x8xf32>
    %73 = arith.mulf %68, %72 : vector<2x8x8xf32>
    "tpu.trace_start"() <{level = 10 : i32, message = "bqk,bkd->bqd"}> : () -> ()
    %cst_27 = arith.constant dense<0.000000e+00> : vector<2x8x4xf32>
    %74 = tpu.matmul %73, %62, %cst_27 {dimension_numbers = #tpu.dot_dimension_numbers<[2], [1], [1], [2], [0, 0, 0, 1, 1, 2], [0], [0]>} : vector<2x8x8xf32>, vector<2x8x4xf32>, vector<2x8x4xf32> -> vector<2x8x4xf32>
    "tpu.trace_stop"() : () -> ()
    %75 = vector.shape_cast %74 : vector<2x8x4xf32> to vector<16x4xf32>
    %76 = vector.extract_strided_slice %39 {offsets = [4, 0], sizes = [4, 32], strides = [1, 1]} : vector<32x32xf32> to vector<4x32xf32>
    %cst_28 = arith.constant dense<0.000000e+00> : vector<16x32xf32>
    %77 = tpu.matmul %75, %76, %cst_28 {dimension_numbers = #tpu.dot_dimension_numbers<[1], [0], [0], [1], [0, 0, 1, 1], [], []>} : vector<16x4xf32>, vector<4x32xf32>, vector<16x32xf32> -> vector<16x32xf32>
    %78 = arith.addf %59, %77 : vector<16x32xf32>
    %79 = vector.extract_strided_slice %36 {offsets = [0, 0, 8], sizes = [2, 8, 4], strides = [1, 1, 1]} : vector<2x8x32xf32> to vector<2x8x4xf32>
    %80 = vector.extract_strided_slice %37 {offsets = [0, 0, 8], sizes = [2, 8, 4], strides = [1, 1, 1]} : vector<2x8x32xf32> to vector<2x8x4xf32>
    %81 = vector.extract_strided_slice %38 {offsets = [0, 0, 8], sizes = [2, 8, 4], strides = [1, 1, 1]} : vector<2x8x32xf32> to vector<2x8x4xf32>
    "tpu.trace_start"() <{level = 10 : i32, message = "bqd,bkd->bqk"}> : () -> ()
    %cst_29 = arith.constant dense<0.000000e+00> : vector<2x8x8xf32>
    %82 = tpu.matmul %79, %80, %cst_29 {dimension_numbers = #tpu.dot_dimension_numbers<[2], [2], [1], [1], [0, 0, 0, 1, 1, 1], [0], [0]>} : vector<2x8x4xf32>, vector<2x8x4xf32>, vector<2x8x8xf32> -> vector<2x8x8xf32>
    "tpu.trace_stop"() : () -> ()
    %cst_30 = arith.constant dense<0xFF800000> : vector<2x8xf32>
    %83 = vector.multi_reduction <maximumf>, %82, %cst_30 [2] : vector<2x8x8xf32> to vector<2x8xf32>
    %84 = vector.shape_cast %83 : vector<2x8xf32> to vector<2x8x1xf32>
    %85 = vector.broadcast %84 : vector<2x8x1xf32> to vector<2x8x8xf32>
    %86 = arith.subf %82, %85 : vector<2x8x8xf32>
    %87 = math.exp %86 : vector<2x8x8xf32>
    %cst_31 = arith.constant dense<0.000000e+00> : vector<2x8xf32>
    %88 = vector.multi_reduction <add>, %87, %cst_31 [2] : vector<2x8x8xf32> to vector<2x8xf32>
    %89 = vector.shape_cast %88 : vector<2x8xf32> to vector<2x8x1xf32>
    %90 = tpu.reciprocal %89 {approx = true} : vector<2x8x1xf32> -> vector<2x8x1xf32>
    %91 = vector.broadcast %90 : vector<2x8x1xf32> to vector<2x8x8xf32>
    %92 = arith.mulf %87, %91 : vector<2x8x8xf32>
    "tpu.trace_start"() <{level = 10 : i32, message = "bqk,bkd->bqd"}> : () -> ()
    %cst_32 = arith.constant dense<0.000000e+00> : vector<2x8x4xf32>
    %93 = tpu.matmul %92, %81, %cst_32 {dimension_numbers = #tpu.dot_dimension_numbers<[2], [1], [1], [2], [0, 0, 0, 1, 1, 2], [0], [0]>} : vector<2x8x8xf32>, vector<2x8x4xf32>, vector<2x8x4xf32> -> vector<2x8x4xf32>
    "tpu.trace_stop"() : () -> ()
    %94 = vector.shape_cast %93 : vector<2x8x4xf32> to vector<16x4xf32>
    %95 = vector.extract_strided_slice %39 {offsets = [8, 0], sizes = [4, 32], strides = [1, 1]} : vector<32x32xf32> to vector<4x32xf32>
    %cst_33 = arith.constant dense<0.000000e+00> : vector<16x32xf32>
    %96 = tpu.matmul %94, %95, %cst_33 {dimension_numbers = #tpu.dot_dimension_numbers<[1], [0], [0], [1], [0, 0, 1, 1], [], []>} : vector<16x4xf32>, vector<4x32xf32>, vector<16x32xf32> -> vector<16x32xf32>
    %97 = arith.addf %78, %96 : vector<16x32xf32>
    %98 = vector.extract_strided_slice %36 {offsets = [0, 0, 12], sizes = [2, 8, 4], strides = [1, 1, 1]} : vector<2x8x32xf32> to vector<2x8x4xf32>
    %99 = vector.extract_strided_slice %37 {offsets = [0, 0, 12], sizes = [2, 8, 4], strides = [1, 1, 1]} : vector<2x8x32xf32> to vector<2x8x4xf32>
    %100 = vector.extract_strided_slice %38 {offsets = [0, 0, 12], sizes = [2, 8, 4], strides = [1, 1, 1]} : vector<2x8x32xf32> to vector<2x8x4xf32>
    "tpu.trace_start"() <{level = 10 : i32, message = "bqd,bkd->bqk"}> : () -> ()
    %cst_34 = arith.constant dense<0.000000e+00> : vector<2x8x8xf32>
    %101 = tpu.matmul %98, %99, %cst_34 {dimension_numbers = #tpu.dot_dimension_numbers<[2], [2], [1], [1], [0, 0, 0, 1, 1, 1], [0], [0]>} : vector<2x8x4xf32>, vector<2x8x4xf32>, vector<2x8x8xf32> -> vector<2x8x8xf32>
    "tpu.trace_stop"() : () -> ()
    %cst_35 = arith.constant dense<0xFF800000> : vector<2x8xf32>
    %102 = vector.multi_reduction <maximumf>, %101, %cst_35 [2] : vector<2x8x8xf32> to vector<2x8xf32>
    %103 = vector.shape_cast %102 : vector<2x8xf32> to vector<2x8x1xf32>
    %104 = vector.broadcast %103 : vector<2x8x1xf32> to vector<2x8x8xf32>
    %105 = arith.subf %101, %104 : vector<2x8x8xf32>
    %106 = math.exp %105 : vector<2x8x8xf32>
    %cst_36 = arith.constant dense<0.000000e+00> : vector<2x8xf32>
    %107 = vector.multi_reduction <add>, %106, %cst_36 [2] : vector<2x8x8xf32> to vector<2x8xf32>
    %108 = vector.shape_cast %107 : vector<2x8xf32> to vector<2x8x1xf32>
    %109 = tpu.reciprocal %108 {approx = true} : vector<2x8x1xf32> -> vector<2x8x1xf32>
    %110 = vector.broadcast %109 : vector<2x8x1xf32> to vector<2x8x8xf32>
    %111 = arith.mulf %106, %110 : vector<2x8x8xf32>
    "tpu.trace_start"() <{level = 10 : i32, message = "bqk,bkd->bqd"}> : () -> ()
    %cst_37 = arith.constant dense<0.000000e+00> : vector<2x8x4xf32>
    %112 = tpu.matmul %111, %100, %cst_37 {dimension_numbers = #tpu.dot_dimension_numbers<[2], [1], [1], [2], [0, 0, 0, 1, 1, 2], [0], [0]>} : vector<2x8x8xf32>, vector<2x8x4xf32>, vector<2x8x4xf32> -> vector<2x8x4xf32>
    "tpu.trace_stop"() : () -> ()
    %113 = vector.shape_cast %112 : vector<2x8x4xf32> to vector<16x4xf32>
    %114 = vector.extract_strided_slice %39 {offsets = [12, 0], sizes = [4, 32], strides = [1, 1]} : vector<32x32xf32> to vector<4x32xf32>
    %cst_38 = arith.constant dense<0.000000e+00> : vector<16x32xf32>
    %115 = tpu.matmul %113, %114, %cst_38 {dimension_numbers = #tpu.dot_dimension_numbers<[1], [0], [0], [1], [0, 0, 1, 1], [], []>} : vector<16x4xf32>, vector<4x32xf32>, vector<16x32xf32> -> vector<16x32xf32>
    %116 = arith.addf %97, %115 : vector<16x32xf32>
    %117 = vector.extract_strided_slice %36 {offsets = [0, 0, 16], sizes = [2, 8, 4], strides = [1, 1, 1]} : vector<2x8x32xf32> to vector<2x8x4xf32>
    %118 = vector.extract_strided_slice %37 {offsets = [0, 0, 16], sizes = [2, 8, 4], strides = [1, 1, 1]} : vector<2x8x32xf32> to vector<2x8x4xf32>
    %119 = vector.extract_strided_slice %38 {offsets = [0, 0, 16], sizes = [2, 8, 4], strides = [1, 1, 1]} : vector<2x8x32xf32> to vector<2x8x4xf32>
    "tpu.trace_start"() <{level = 10 : i32, message = "bqd,bkd->bqk"}> : () -> ()
    %cst_39 = arith.constant dense<0.000000e+00> : vector<2x8x8xf32>
    %120 = tpu.matmul %117, %118, %cst_39 {dimension_numbers = #tpu.dot_dimension_numbers<[2], [2], [1], [1], [0, 0, 0, 1, 1, 1], [0], [0]>} : vector<2x8x4xf32>, vector<2x8x4xf32>, vector<2x8x8xf32> -> vector<2x8x8xf32>
    "tpu.trace_stop"() : () -> ()
    %cst_40 = arith.constant dense<0xFF800000> : vector<2x8xf32>
    %121 = vector.multi_reduction <maximumf>, %120, %cst_40 [2] : vector<2x8x8xf32> to vector<2x8xf32>
    %122 = vector.shape_cast %121 : vector<2x8xf32> to vector<2x8x1xf32>
    %123 = vector.broadcast %122 : vector<2x8x1xf32> to vector<2x8x8xf32>
    %124 = arith.subf %120, %123 : vector<2x8x8xf32>
    %125 = math.exp %124 : vector<2x8x8xf32>
    %cst_41 = arith.constant dense<0.000000e+00> : vector<2x8xf32>
    %126 = vector.multi_reduction <add>, %125, %cst_41 [2] : vector<2x8x8xf32> to vector<2x8xf32>
    %127 = vector.shape_cast %126 : vector<2x8xf32> to vector<2x8x1xf32>
    %128 = tpu.reciprocal %127 {approx = true} : vector<2x8x1xf32> -> vector<2x8x1xf32>
    %129 = vector.broadcast %128 : vector<2x8x1xf32> to vector<2x8x8xf32>
    %130 = arith.mulf %125, %129 : vector<2x8x8xf32>
    "tpu.trace_start"() <{level = 10 : i32, message = "bqk,bkd->bqd"}> : () -> ()
    %cst_42 = arith.constant dense<0.000000e+00> : vector<2x8x4xf32>
    %131 = tpu.matmul %130, %119, %cst_42 {dimension_numbers = #tpu.dot_dimension_numbers<[2], [1], [1], [2], [0, 0, 0, 1, 1, 2], [0], [0]>} : vector<2x8x8xf32>, vector<2x8x4xf32>, vector<2x8x4xf32> -> vector<2x8x4xf32>
    "tpu.trace_stop"() : () -> ()
    %132 = vector.shape_cast %131 : vector<2x8x4xf32> to vector<16x4xf32>
    %133 = vector.extract_strided_slice %39 {offsets = [16, 0], sizes = [4, 32], strides = [1, 1]} : vector<32x32xf32> to vector<4x32xf32>
    %cst_43 = arith.constant dense<0.000000e+00> : vector<16x32xf32>
    %134 = tpu.matmul %132, %133, %cst_43 {dimension_numbers = #tpu.dot_dimension_numbers<[1], [0], [0], [1], [0, 0, 1, 1], [], []>} : vector<16x4xf32>, vector<4x32xf32>, vector<16x32xf32> -> vector<16x32xf32>
    %135 = arith.addf %116, %134 : vector<16x32xf32>
    %136 = vector.extract_strided_slice %36 {offsets = [0, 0, 20], sizes = [2, 8, 4], strides = [1, 1, 1]} : vector<2x8x32xf32> to vector<2x8x4xf32>
    %137 = vector.extract_strided_slice %37 {offsets = [0, 0, 20], sizes = [2, 8, 4], strides = [1, 1, 1]} : vector<2x8x32xf32> to vector<2x8x4xf32>
    %138 = vector.extract_strided_slice %38 {offsets = [0, 0, 20], sizes = [2, 8, 4], strides = [1, 1, 1]} : vector<2x8x32xf32> to vector<2x8x4xf32>
    "tpu.trace_start"() <{level = 10 : i32, message = "bqd,bkd->bqk"}> : () -> ()
    %cst_44 = arith.constant dense<0.000000e+00> : vector<2x8x8xf32>
    %139 = tpu.matmul %136, %137, %cst_44 {dimension_numbers = #tpu.dot_dimension_numbers<[2], [2], [1], [1], [0, 0, 0, 1, 1, 1], [0], [0]>} : vector<2x8x4xf32>, vector<2x8x4xf32>, vector<2x8x8xf32> -> vector<2x8x8xf32>
    "tpu.trace_stop"() : () -> ()
    %cst_45 = arith.constant dense<0xFF800000> : vector<2x8xf32>
    %140 = vector.multi_reduction <maximumf>, %139, %cst_45 [2] : vector<2x8x8xf32> to vector<2x8xf32>
    %141 = vector.shape_cast %140 : vector<2x8xf32> to vector<2x8x1xf32>
    %142 = vector.broadcast %141 : vector<2x8x1xf32> to vector<2x8x8xf32>
    %143 = arith.subf %139, %142 : vector<2x8x8xf32>
    %144 = math.exp %143 : vector<2x8x8xf32>
    %cst_46 = arith.constant dense<0.000000e+00> : vector<2x8xf32>
    %145 = vector.multi_reduction <add>, %144, %cst_46 [2] : vector<2x8x8xf32> to vector<2x8xf32>
    %146 = vector.shape_cast %145 : vector<2x8xf32> to vector<2x8x1xf32>
    %147 = tpu.reciprocal %146 {approx = true} : vector<2x8x1xf32> -> vector<2x8x1xf32>
    %148 = vector.broadcast %147 : vector<2x8x1xf32> to vector<2x8x8xf32>
    %149 = arith.mulf %144, %148 : vector<2x8x8xf32>
    "tpu.trace_start"() <{level = 10 : i32, message = "bqk,bkd->bqd"}> : () -> ()
    %cst_47 = arith.constant dense<0.000000e+00> : vector<2x8x4xf32>
    %150 = tpu.matmul %149, %138, %cst_47 {dimension_numbers = #tpu.dot_dimension_numbers<[2], [1], [1], [2], [0, 0, 0, 1, 1, 2], [0], [0]>} : vector<2x8x8xf32>, vector<2x8x4xf32>, vector<2x8x4xf32> -> vector<2x8x4xf32>
    "tpu.trace_stop"() : () -> ()
    %151 = vector.shape_cast %150 : vector<2x8x4xf32> to vector<16x4xf32>
    %152 = vector.extract_strided_slice %39 {offsets = [20, 0], sizes = [4, 32], strides = [1, 1]} : vector<32x32xf32> to vector<4x32xf32>
    %cst_48 = arith.constant dense<0.000000e+00> : vector<16x32xf32>
    %153 = tpu.matmul %151, %152, %cst_48 {dimension_numbers = #tpu.dot_dimension_numbers<[1], [0], [0], [1], [0, 0, 1, 1], [], []>} : vector<16x4xf32>, vector<4x32xf32>, vector<16x32xf32> -> vector<16x32xf32>
    %154 = arith.addf %135, %153 : vector<16x32xf32>
    %155 = vector.extract_strided_slice %36 {offsets = [0, 0, 24], sizes = [2, 8, 4], strides = [1, 1, 1]} : vector<2x8x32xf32> to vector<2x8x4xf32>
    %156 = vector.extract_strided_slice %37 {offsets = [0, 0, 24], sizes = [2, 8, 4], strides = [1, 1, 1]} : vector<2x8x32xf32> to vector<2x8x4xf32>
    %157 = vector.extract_strided_slice %38 {offsets = [0, 0, 24], sizes = [2, 8, 4], strides = [1, 1, 1]} : vector<2x8x32xf32> to vector<2x8x4xf32>
    "tpu.trace_start"() <{level = 10 : i32, message = "bqd,bkd->bqk"}> : () -> ()
    %cst_49 = arith.constant dense<0.000000e+00> : vector<2x8x8xf32>
    %158 = tpu.matmul %155, %156, %cst_49 {dimension_numbers = #tpu.dot_dimension_numbers<[2], [2], [1], [1], [0, 0, 0, 1, 1, 1], [0], [0]>} : vector<2x8x4xf32>, vector<2x8x4xf32>, vector<2x8x8xf32> -> vector<2x8x8xf32>
    "tpu.trace_stop"() : () -> ()
    %cst_50 = arith.constant dense<0xFF800000> : vector<2x8xf32>
    %159 = vector.multi_reduction <maximumf>, %158, %cst_50 [2] : vector<2x8x8xf32> to vector<2x8xf32>
    %160 = vector.shape_cast %159 : vector<2x8xf32> to vector<2x8x1xf32>
    %161 = vector.broadcast %160 : vector<2x8x1xf32> to vector<2x8x8xf32>
    %162 = arith.subf %158, %161 : vector<2x8x8xf32>
    %163 = math.exp %162 : vector<2x8x8xf32>
    %cst_51 = arith.constant dense<0.000000e+00> : vector<2x8xf32>
    %164 = vector.multi_reduction <add>, %163, %cst_51 [2] : vector<2x8x8xf32> to vector<2x8xf32>
    %165 = vector.shape_cast %164 : vector<2x8xf32> to vector<2x8x1xf32>
    %166 = tpu.reciprocal %165 {approx = true} : vector<2x8x1xf32> -> vector<2x8x1xf32>
    %167 = vector.broadcast %166 : vector<2x8x1xf32> to vector<2x8x8xf32>
    %168 = arith.mulf %163, %167 : vector<2x8x8xf32>
    "tpu.trace_start"() <{level = 10 : i32, message = "bqk,bkd->bqd"}> : () -> ()
    %cst_52 = arith.constant dense<0.000000e+00> : vector<2x8x4xf32>
    %169 = tpu.matmul %168, %157, %cst_52 {dimension_numbers = #tpu.dot_dimension_numbers<[2], [1], [1], [2], [0, 0, 0, 1, 1, 2], [0], [0]>} : vector<2x8x8xf32>, vector<2x8x4xf32>, vector<2x8x4xf32> -> vector<2x8x4xf32>
    "tpu.trace_stop"() : () -> ()
    %170 = vector.shape_cast %169 : vector<2x8x4xf32> to vector<16x4xf32>
    %171 = vector.extract_strided_slice %39 {offsets = [24, 0], sizes = [4, 32], strides = [1, 1]} : vector<32x32xf32> to vector<4x32xf32>
    %cst_53 = arith.constant dense<0.000000e+00> : vector<16x32xf32>
    %172 = tpu.matmul %170, %171, %cst_53 {dimension_numbers = #tpu.dot_dimension_numbers<[1], [0], [0], [1], [0, 0, 1, 1], [], []>} : vector<16x4xf32>, vector<4x32xf32>, vector<16x32xf32> -> vector<16x32xf32>
    %173 = arith.addf %154, %172 : vector<16x32xf32>
    %174 = vector.extract_strided_slice %36 {offsets = [0, 0, 28], sizes = [2, 8, 4], strides = [1, 1, 1]} : vector<2x8x32xf32> to vector<2x8x4xf32>
    %175 = vector.extract_strided_slice %37 {offsets = [0, 0, 28], sizes = [2, 8, 4], strides = [1, 1, 1]} : vector<2x8x32xf32> to vector<2x8x4xf32>
    %176 = vector.extract_strided_slice %38 {offsets = [0, 0, 28], sizes = [2, 8, 4], strides = [1, 1, 1]} : vector<2x8x32xf32> to vector<2x8x4xf32>
    "tpu.trace_start"() <{level = 10 : i32, message = "bqd,bkd->bqk"}> : () -> ()
    %cst_54 = arith.constant dense<0.000000e+00> : vector<2x8x8xf32>
    %177 = tpu.matmul %174, %175, %cst_54 {dimension_numbers = #tpu.dot_dimension_numbers<[2], [2], [1], [1], [0, 0, 0, 1, 1, 1], [0], [0]>} : vector<2x8x4xf32>, vector<2x8x4xf32>, vector<2x8x8xf32> -> vector<2x8x8xf32>
    "tpu.trace_stop"() : () -> ()
    %cst_55 = arith.constant dense<0xFF800000> : vector<2x8xf32>
    %178 = vector.multi_reduction <maximumf>, %177, %cst_55 [2] : vector<2x8x8xf32> to vector<2x8xf32>
    %179 = vector.shape_cast %178 : vector<2x8xf32> to vector<2x8x1xf32>
    %180 = vector.broadcast %179 : vector<2x8x1xf32> to vector<2x8x8xf32>
    %181 = arith.subf %177, %180 : vector<2x8x8xf32>
    %182 = math.exp %181 : vector<2x8x8xf32>
    %cst_56 = arith.constant dense<0.000000e+00> : vector<2x8xf32>
    %183 = vector.multi_reduction <add>, %182, %cst_56 [2] : vector<2x8x8xf32> to vector<2x8xf32>
    %184 = vector.shape_cast %183 : vector<2x8xf32> to vector<2x8x1xf32>
    %185 = tpu.reciprocal %184 {approx = true} : vector<2x8x1xf32> -> vector<2x8x1xf32>
    %186 = vector.broadcast %185 : vector<2x8x1xf32> to vector<2x8x8xf32>
    %187 = arith.mulf %182, %186 : vector<2x8x8xf32>
    "tpu.trace_start"() <{level = 10 : i32, message = "bqk,bkd->bqd"}> : () -> ()
    %cst_57 = arith.constant dense<0.000000e+00> : vector<2x8x4xf32>
    %188 = tpu.matmul %187, %176, %cst_57 {dimension_numbers = #tpu.dot_dimension_numbers<[2], [1], [1], [2], [0, 0, 0, 1, 1, 2], [0], [0]>} : vector<2x8x8xf32>, vector<2x8x4xf32>, vector<2x8x4xf32> -> vector<2x8x4xf32>
    "tpu.trace_stop"() : () -> ()
    %189 = vector.shape_cast %188 : vector<2x8x4xf32> to vector<16x4xf32>
    %190 = vector.extract_strided_slice %39 {offsets = [28, 0], sizes = [4, 32], strides = [1, 1]} : vector<32x32xf32> to vector<4x32xf32>
    %cst_58 = arith.constant dense<0.000000e+00> : vector<16x32xf32>
    %191 = tpu.matmul %189, %190, %cst_58 {dimension_numbers = #tpu.dot_dimension_numbers<[1], [0], [0], [1], [0, 0, 1, 1], [], []>} : vector<16x4xf32>, vector<4x32xf32>, vector<16x32xf32> -> vector<16x32xf32>
    %192 = arith.addf %173, %191 : vector<16x32xf32>
    %193 = arith.addf %1, %192 : vector<16x32xf32>
    %c0_59 = arith.constant 0 : index
    %c0_60 = arith.constant 0 : index
    %194 = vector.load %arg7[%c0_59, %c0_60] : memref<1x32xf32, #tpu.memory_space<vmem>>, vector<1x32xf32>
    %195 = vector.broadcast %194 : vector<1x32xf32> to vector<16x32xf32>
    %196 = arith.addf %193, %195 : vector<16x32xf32>
    %c0_61 = arith.constant 0 : index
    %c0_62 = arith.constant 0 : index
    %197 = vector.load %arg8[%c0_61, %c0_62] : memref<1x32xf32, #tpu.memory_space<vmem>>, vector<1x32xf32>
    %c0_63 = arith.constant 0 : index
    %c0_64 = arith.constant 0 : index
    %198 = vector.load %arg9[%c0_63, %c0_64] : memref<1x32xf32, #tpu.memory_space<vmem>>, vector<1x32xf32>
    %cst_65 = arith.constant dense<0.000000e+00> : vector<16xf32>
    %199 = vector.multi_reduction <add>, %196, %cst_65 [1] : vector<16x32xf32> to vector<16xf32>
    %200 = vector.shape_cast %199 : vector<16xf32> to vector<16x1xf32>
    %cst_66 = arith.constant 3.200000e+01 : f32
    %201 = vector.broadcast %cst_66 : f32 to vector<16x1xf32>
    %202 = arith.divf %200, %201 : vector<16x1xf32>
    %203 = vector.broadcast %202 : vector<16x1xf32> to vector<16x32xf32>
    %204 = arith.subf %196, %203 : vector<16x32xf32>
    %205 = arith.mulf %204, %204 : vector<16x32xf32>
    %cst_67 = arith.constant dense<0.000000e+00> : vector<16xf32>
    %206 = vector.multi_reduction <add>, %205, %cst_67 [1] : vector<16x32xf32> to vector<16xf32>
    %207 = vector.shape_cast %206 : vector<16xf32> to vector<16x1xf32>
    %cst_68 = arith.constant 3.200000e+01 : f32
    %208 = vector.broadcast %cst_68 : f32 to vector<16x1xf32>
    %209 = arith.divf %207, %208 : vector<16x1xf32>
    %210 = vector.broadcast %202 : vector<16x1xf32> to vector<16x32xf32>
    %211 = arith.subf %196, %210 : vector<16x32xf32>
    %cst_69 = arith.constant 9.99999974E-6 : f32
    %212 = vector.broadcast %cst_69 : f32 to vector<16x1xf32>
    %213 = arith.addf %209, %212 : vector<16x1xf32>
    %214 = math.rsqrt %213 : vector<16x1xf32>
    %215 = vector.broadcast %214 : vector<16x1xf32> to vector<16x32xf32>
    %216 = arith.mulf %211, %215 : vector<16x32xf32>
    %217 = vector.broadcast %197 : vector<1x32xf32> to vector<16x32xf32>
    %218 = arith.mulf %216, %217 : vector<16x32xf32>
    %219 = vector.broadcast %198 : vector<1x32xf32> to vector<16x32xf32>
    %220 = arith.addf %218, %219 : vector<16x32xf32>
    %c0_70 = arith.constant 0 : index
    %c0_71 = arith.constant 0 : index
    %221 = vector.load %arg10[%c0_70, %c0_71] : memref<32x128xf32, #tpu.memory_space<vmem>>, vector<32x128xf32>
    %cst_72 = arith.constant dense<0.000000e+00> : vector<16x128xf32>
    %222 = tpu.matmul %220, %221, %cst_72 {dimension_numbers = #tpu.dot_dimension_numbers<[1], [0], [0], [1], [0, 0, 1, 1], [], []>} : vector<16x32xf32>, vector<32x128xf32>, vector<16x128xf32> -> vector<16x128xf32>
    %c0_73 = arith.constant 0 : index
    %c0_74 = arith.constant 0 : index
    %223 = vector.load %arg11[%c0_73, %c0_74] : memref<1x128xf32, #tpu.memory_space<vmem>>, vector<1x128xf32>
    %224 = vector.broadcast %223 : vector<1x128xf32> to vector<16x128xf32>
    %225 = arith.addf %222, %224 : vector<16x128xf32>
    %cst_75 = arith.constant 0.000000e+00 : f32
    %226 = vector.broadcast %cst_75 : f32 to vector<16x128xf32>
    %227 = arith.maximumf %225, %226 : vector<16x128xf32>
    %c0_76 = arith.constant 0 : index
    %c0_77 = arith.constant 0 : index
    %228 = vector.load %arg12[%c0_76, %c0_77] : memref<128x32xf32, #tpu.memory_space<vmem>>, vector<128x32xf32>
    %cst_78 = arith.constant dense<0.000000e+00> : vector<16x32xf32>
    %229 = tpu.matmul %227, %228, %cst_78 {dimension_numbers = #tpu.dot_dimension_numbers<[1], [0], [0], [1], [0, 0, 1, 1], [], []>} : vector<16x128xf32>, vector<128x32xf32>, vector<16x32xf32> -> vector<16x32xf32>
    %c0_79 = arith.constant 0 : index
    %c0_80 = arith.constant 0 : index
    %230 = vector.load %arg13[%c0_79, %c0_80] : memref<1x32xf32, #tpu.memory_space<vmem>>, vector<1x32xf32>
    %231 = vector.broadcast %230 : vector<1x32xf32> to vector<16x32xf32>
    %232 = arith.addf %229, %231 : vector<16x32xf32>
    %233 = arith.addf %196, %232 : vector<16x32xf32>
    %234 = vector.shape_cast %233 : vector<16x32xf32> to vector<2x8x32xf32>
    %c0_81 = arith.constant 0 : index
    %c0_82 = arith.constant 0 : index
    %c0_83 = arith.constant 0 : index
    %235 = vector.load %arg14[%c0_81, %c0_82, %c0_83] : memref<2x8x32xf32, #tpu.memory_space<vmem>>, vector<2x8x32xf32>
    tpu.vector_store %arg14[%c0_81, %c0_82, %c0_83], %234 {strides = array<i32>} : memref<2x8x32xf32, #tpu.memory_space<vmem>>, vector<2x8x32xf32>,
    return
  }
  func.func @transform_0(%arg0: i32) -> (i32, i32, i32) {
    %c0_i32 = arith.constant 0 : i32
    %c0_i32_0 = arith.constant 0 : i32
    %c0_i32_1 = arith.constant 0 : i32
    return %arg0, %c0_i32, %c0_i32_0 : i32, i32, i32
  }
  func.func @transform_1(%arg0: i32) -> (i32, i32) {
    %c0_i32 = arith.constant 0 : i32
    %c0_i32_0 = arith.constant 0 : i32
    %c0_i32_1 = arith.constant 0 : i32
    return %c0_i32, %c0_i32_0 : i32, i32
  }
  func.func @transform_2(%arg0: i32) -> (i32, i32) {
    %c0_i32 = arith.constant 0 : i32
    %c0_i32_0 = arith.constant 0 : i32
    %c0_i32_1 = arith.constant 0 : i32
    return %c0_i32, %c0_i32_0 : i32, i32
  }
  func.func @transform_3(%arg0: i32) -> (i32, i32) {
    %c0_i32 = arith.constant 0 : i32
    %c0_i32_0 = arith.constant 0 : i32
    %c0_i32_1 = arith.constant 0 : i32
    return %c0_i32, %c0_i32_0 : i32, i32
  }
  func.func @transform_4(%arg0: i32) -> (i32, i32) {
    %c0_i32 = arith.constant 0 : i32
    %c0_i32_0 = arith.constant 0 : i32
    %c0_i32_1 = arith.constant 0 : i32
    return %c0_i32, %c0_i32_0 : i32, i32
  }
  func.func @transform_5(%arg0: i32) -> (i32, i32) {
    %c0_i32 = arith.constant 0 : i32
    %c0_i32_0 = arith.constant 0 : i32
    %c0_i32_1 = arith.constant 0 : i32
    return %c0_i32, %c0_i32_0 : i32, i32
  }
  func.func @transform_6(%arg0: i32) -> (i32, i32) {
    %c0_i32 = arith.constant 0 : i32
    %c0_i32_0 = arith.constant 0 : i32
    %c0_i32_1 = arith.constant 0 : i32
    return %c0_i32, %c0_i32_0 : i32, i32
  }
  func.func @transform_7(%arg0: i32) -> (i32, i32) {
    %c0_i32 = arith.constant 0 : i32
    %c0_i32_0 = arith.constant 0 : i32
    %c0_i32_1 = arith.constant 0 : i32
    return %c0_i32, %c0_i32_0 : i32, i32
  }
  func.func @transform_8(%arg0: i32) -> (i32, i32) {
    %c0_i32 = arith.constant 0 : i32
    %c0_i32_0 = arith.constant 0 : i32
    %c0_i32_1 = arith.constant 0 : i32
    return %c0_i32, %c0_i32_0 : i32, i32
  }
  func.func @transform_9(%arg0: i32) -> (i32, i32) {
    %c0_i32 = arith.constant 0 : i32
    %c0_i32_0 = arith.constant 0 : i32
    %c0_i32_1 = arith.constant 0 : i32
    return %c0_i32, %c0_i32_0 : i32, i32
  }
  func.func @transform_10(%arg0: i32) -> (i32, i32) {
    %c0_i32 = arith.constant 0 : i32
    %c0_i32_0 = arith.constant 0 : i32
    %c0_i32_1 = arith.constant 0 : i32
    return %c0_i32, %c0_i32_0 : i32, i32
  }
  func.func @transform_11(%arg0: i32) -> (i32, i32) {
    %c0_i32 = arith.constant 0 : i32
    %c0_i32_0 = arith.constant 0 : i32
    %c0_i32_1 = arith.constant 0 : i32
    return %c0_i32, %c0_i32_0 : i32, i32
  }
  func.func @transform_12(%arg0: i32) -> (i32, i32) {
    %c0_i32 = arith.constant 0 : i32
    %c0_i32_0 = arith.constant 0 : i32
    %c0_i32_1 = arith.constant 0 : i32
    return %c0_i32, %c0_i32_0 : i32, i32
  }
  func.func @transform_13(%arg0: i32) -> (i32, i32, i32) {
    %c0_i32 = arith.constant 0 : i32
    %c0_i32_0 = arith.constant 0 : i32
    %c0_i32_1 = arith.constant 0 : i32
    return %arg0, %c0_i32, %c0_i32_0 : i32, i32, i32
  }
}

</mosaic_0001>

<bundles_post_ra>
// kernel: encoder_layer.1
= control target key start
LH: loop header
LB: loop body
LE: loop exit
PB: predicated region body
PF: predicated region fallthrough
CT: control target
= control target key end

     0   :  { %vm49_vm0 = vcmask 261120   ;;  %s5007_s0 = inlined_call_operand.vmem [shape: f32[2,8,32], index: 0, kind: input, shape index: {}]   ;;  %s5008_s1 = inlined_call_operand.vmem [shape: f32[1,32], index: 1, kind: input, shape index: {}]   ;;  %s5009_s2 = inlined_call_operand.vmem [shape: f32[1,32], index: 2, kind: input, shape index: {}]   ;;  %s5010_s3 = inlined_call_operand.vmem [shape: f32[32,96], index: 3, kind: input, shape index: {}]   ;;  %s5011_s4 = inlined_call_operand.vmem [shape: f32[1,96], index: 4, kind: input, shape index: {}]   ;;  %s5012_s5 = inlined_call_operand.vmem [shape: f32[32,32], index: 5, kind: input, shape index: {}]   ;;  %s5013_s6 = inlined_call_operand.vmem [shape: f32[1,32], index: 6, kind: input, shape index: {}]   ;;  %s5014_s7 = inlined_call_operand.vmem [shape: f32[1,32], index: 7, kind: input, shape index: {}]   ;;  %s5015_s8 = inlined_call_operand.vmem [shape: f32[1,32], index: 8, kind: input, shape index: {}]   ;;  %s5016_s9 = inlined_call_operand.vmem [shape: f32[32,128], index: 9, kind: input, shape index: {}]   ;;  %s5017_s10 = inlined_call_operand.vmem [shape: f32[1,128], index: 10, kind: input, shape index: {}]   ;;  %s5018_s11 = inlined_call_operand.vmem [shape: f32[128,32], index: 11, kind: input, shape index: {}]   ;;  %s5019_s12 = inlined_call_operand.vmem [shape: f32[1,32], index: 12, kind: input, shape index: {}]   ;;  %s5020_s13 = inlined_call_operand.hbm [shape: f32[2,8,32], index: 13, kind: output, shape index: {}]  }
   0x1   :  { %v45_v0 = vld [vmem:[%s5007_s0] sm:$0xff]  ;;  %v46_v1 = vld [vmem:[%s5007_s0 + $0x8] sm:$0xff] }
   0x2   :  { %18 = vsyncpa [#allocation3], 0  ;;  %v50_v2 = vsel %vm49_vm0, %v45_v0, 0.0  ;;  %v53_v3 = vsel %vm49_vm0, %v46_v1, 0.0  ;;  %v93_v14 = vld [vmem:[%s5010_s3] sm:$0xff]  ;;  %v94_v15 = vld [vmem:[%s5010_s3 + $0x8] sm:$0xff] }
   0x3   :  { %51 = vadd.xlane.f32.xlu0 %v50_v2  ;;  %v95_v16 = vld [vmem:[%s5010_s3 + $0x10] sm:$0xff]  ;;  %v4244_v17 = vpack.c.bf16 %v94_v15, %v93_v14  ;;  %v96_v18 = vld [vmem:[%s5010_s3 + $0x18] sm:$0xff]  ;;  %v3785_v27 = vld [vmem:[%s5008_s1] ss:$0 sm:$0xff]  ;;  %v4432_v36 = vmov 0.0   ;;  %vm4433_vm1 = vmmov 0  }
   0x4   :  { %v4248_v19 = vpack.c.bf16 %v96_v18, %v95_v16  ;;  %v3786_v29 = vld [vmem:[%s5009_s2] ss:$0 sm:$0xff]  ;;  %4028 = vmatprep.subr.mxu0 %v4432_v36  ;;  %4030 = vmatprep.mubr.msk.f32.mxu0 %vm4433_vm1, %v4432_v36  ;;  %s4434_s23 = smov 96   ;;  %vm194_vm2 = vcmask 31744   ;;  %vm348_vm3 = vcmask 64512   ;;  %s4436_s24 = smov 92  }
   0x5   :  { %4245 = vmatprep.subr.bf16.mxu1 %v4244_v17  ;;  %v3787_v37 = vld [vmem:[%s5011_s4] ss:$0 sm:$0xff]  ;;  %s4435_s4 = smov 64   ;;  %s4437_s25 = smov 124   ;;  %vm861_vm4 = vcmask 1043456  }
   0x6   :  { %4247 = vmatpush3.bf16.msra.mxu1 %v4244_v17  ;;  %s4438_s26 = smov 88   ;;  %s4439_s27 = smov 60  }
   0x7   :  { %54 = vadd.xlane.f32.xlu0 %v53_v3  ;;  %4249 = vmatprep.subr.bf16.mxu1 %v4248_v19  ;;  %s4440_s28 = smov 120   ;;  %s4441_s29 = smov 56  }
   0x8   :  { %s4442_s30 = smov 84   ;;  %s4443_s14 = smov 116  }
   0x9   :  { %s4444_s17 = smov 80   ;;  %s4445_s20 = smov 52  }
   0xa   :  { %4251 = vmatpush3.bf16.msra.mxu1 %v4248_v19  ;;  %s4446_s21 = smov 112   ;;  %s4447_s3 = smov 48  }
   0xb   :  { %3998 = vmatprep.subr.mxu1 %v4432_v36  ;;  %s4448_s22 = smov 76   ;;  %s4449_s1 = smov 108  }
   0xc   :  { %s4450_s2 = smov 72  }
  0x90   :  { %v52_v4 = vpop.xlane.xlu0 %51 }
  0x91   :  { %v57_v5 = vmul.f32 0.03125, %v52_v4 }
  0x93   :  { %v59_v6 = vsub.f32 %v45_v0, %v57_v5 }
  0x94   :  { %v55_v7 = vpop.xlane.xlu0 %54 }
  0x95   :  { %v58_v8 = vmul.f32 0.03125, %v55_v7  ;;  %v61_v9 = vmul.f32 %v59_v6, %v59_v6 }
  0x97   :  { %v60_v10 = vsub.f32 %v46_v1, %v58_v8  ;;  %v63_v11 = vsel %vm49_vm0, %v61_v9, 0.0 }
  0x98   :  { %64 = vadd.xlane.f32.xlu1 %v63_v11 }
  0x99   :  { %v62_v12 = vmul.f32 %v60_v10, %v60_v10 }
  0x9b   :  { %v66_v13 = vsel %vm49_vm0, %v62_v12, 0.0 }
  0x9c   :  { %67 = vadd.xlane.f32.xlu1 %v66_v13 }
 0x125   :  { %v65_v20 = vpop.xlane.xlu1 %64 }
 0x126   :  { %v69_v21 = vmul.f32 0.03125, %v65_v20 }
 0x128   :  { %v71_v22 = vadd.f32 1e-05, %v69_v21 }
 0x129   :  { %v68_v23 = vpop.xlane.xlu1 %67 }
 0x12a   :  { %4334 = vrsqrt.f32 %v71_v22  ;;  %v70_v24 = vmul.f32 0.03125, %v68_v23 }
 0x12c   :  { %v72_v25 = vadd.f32 1e-05, %v70_v24 }
 0x12e   :  { %4336 = vrsqrt.f32 %v72_v25 }
 0x134   :  { %v4335_v26 = vpop.eup %4334 }
 0x135   :  { %v75_v28 = vmul.f32 %v4335_v26, %v59_v6 }
 0x137   :  { %v83_v30 = vmul.f32 %v3785_v27, %v75_v28 }
 0x138   :  { %v4337_v31 = vpop.eup %4336 }
 0x139   :  { %v76_v32 = vmul.f32 %v4337_v31, %v60_v10  ;;  %v91_v33 = vadd.f32 %v3786_v29, %v83_v30 }
 0x13b   :  { %v84_v34 = vmul.f32 %v3785_v27, %v76_v32  ;;  %3995 = vmatprep.mubr.msk.f32.mxu1 %vm49_vm0, %v91_v33 }
 0x13d   :  { %v92_v35 = vadd.f32 %v3786_v29, %v84_v34 }
 0x13f   :  { %3996 = vmatmul.mubr.msk.f32.vlgmr.msra.gmra.mrb[0].mxu1 %vm49_vm0, %v92_v35 }
 0x140   :  { %4000 = vmatprep.mubr.msk.f32.mxu1 %vm4433_vm1, %v4432_v36 }
 0x212   :  { %v3997_v38 = vpop.f32.mrb[0].mxu1 }
 0x213   :  { %v4569_v39 = vadd.f32 %v3997_v38, %v3787_v37  ;;  %v176_v40 = vpop.f32.mrb[1].mxu1 }
 0x214   :  { %v4571_v41 = vadd.f32 %v3787_v37, %v176_v40 }
 0x215   :  { %271 = vrot.lane.b32.xlu1 %v4569_v39, %s4434_s23  ;;  %v4586_v45 = vmul.f32 0.5, %v4569_v39 }
 0x216   :  { %192 = vrot.lane.b32.xlu0 %v4571_v41, %s4434_s23  ;;  %v4577_v43 = vmul.f32 0.5, %v4571_v41 }
 0x287   :  { %v272_v44 = vpop.permute.xlu1 %271 }
 0x288   :  { %v193_v42 = vpop.permute.xlu0 %192 }
 0x289   :  { %3999 = vmatpush3.xpose.msk.msra.mxu1 %vm194_vm2, %v193_v42 }
 0x28a   :  { %4003 = vmatprep.subr.mxu1 %v4432_v36 }
 0x28c   :  { %4001 = vmatmul.mubr.msk.f32.vlgmr.msra.gmra.mrb[2].mxu1 %vm194_vm2, %v4577_v43 }
 0x28d   :  { %4004 = vmatpush3.xpose.msk.msra.mxu1 %vm194_vm2, %v272_v44  ;;  %4005 = vmatprep.mubr.msk.f32.mxu1 %vm4433_vm1, %v4432_v36 }
 0x28e   :  { %4008 = vmatprep.subr.mxu1 %v4432_v36 }
 0x290   :  { %4006 = vmatmul.mubr.msk.f32.vlgmr.msra.gmra.mrb[4].mxu1 %vm194_vm2, %v4586_v45 }
 0x291   :  { %4010 = vmatprep.mubr.msk.f32.mxu1 %vm4433_vm1, %v4432_v36 }
 0x35f   :  { %v266_v46 = vpop.f32.mrb[2].mxu1 }
 0x360   :  { %v4002_v47 = vpop.f32.mrb[3].mxu1  ;;  %v349_v48 = vsel %vm348_vm3, %v266_v46, -inf }
 0x361   :  { %350 = vmax.xlane.f32.xlu1 %v349_v48 }
 0x363   :  { %v344_v49 = vpop.f32.mrb[4].mxu1 }
 0x364   :  { %v4007_v50 = vpop.f32.mrb[5].mxu1  ;;  %v352_v51 = vsel %vm348_vm3, %v344_v49, -inf }
 0x365   :  { %353 = vmax.xlane.f32.xlu0 %v352_v51 }
 0x372   :  { %447 = vrot.lane.b32.xlu1 %v4569_v39, %s4435_s4 }
 0x376   :  { %525 = vrot.lane.b32.xlu1 %v4571_v41, %s4436_s24 }
 0x37a   :  { %523 = vrot.lane.b32.xlu1 %v4577_v43, %s4437_s25 }
 0x3ee   :  { %v351_v52 = vpop.xlane.xlu1 %350 }
 0x3ef   :  { %v355_v53 = vsub.f32 %v266_v46, %v351_v52 }
 0x3f1   :  { %v357_v54 = vmul.f32 1.442695, %v355_v53 }
 0x3f2   :  { %v354_v55 = vpop.xlane.xlu0 %353  ;;  %v448_v62 = vpop.permute.xlu1 %447 }
 0x3f3   :  { %4338 = vpow2.f32 %v357_v54  ;;  %v356_v56 = vsub.f32 %v344_v49, %v354_v55 }
 0x3f5   :  { %v359_v57 = vmul.f32 1.442695, %v356_v56  ;;  %v187_v56 = vld [vmem:[%s5012_s5] sm:$0xff] }
 0x3f6   :  { %v526_v63 = vpop.permute.xlu1 %525 }
 0x3f7   :  { %4340 = vpow2.f32 %v359_v57  ;;  %v854_v57 = vrot.slane %v187_v56, 4 }
 0x3fa   :  { %v524_v0 = vpop.permute.xlu1 %523 }
 0x3fd   :  { %v4339_v58 = vpop.eup %4338 }
 0x3fe   :  { %v361_v59 = vsel %vm348_vm3, %v4339_v58, 0.0 }
 0x3ff   :  { %362 = vadd.xlane.f32.xlu0 %v361_v59 }
 0x401   :  { %v4341_v60 = vpop.eup %4340 }
 0x402   :  { %v364_v61 = vsel %vm348_vm3, %v4341_v60, 0.0 }
 0x403   :  { %365 = vadd.xlane.f32.xlu1 %v364_v61 }
 0x414   :  { %601 = vrot.lane.b32.xlu1 %v4586_v45, %s4437_s25  ;;  %s4452_s25 = smov 104  }
 0x415   :  { %371 = vrot.lane.b32.xlu0 %v4571_v41, %s4435_s4 }
 0x418   :  { %1024 = vrot.lane.b32.xlu1 %v4571_v41, %s4438_s26 }
 0x419   :  { %603 = vrot.lane.b32.xlu0 %v4569_v39, %s4436_s24  ;;  %s4451_s24 = smov 44  }
 0x48c   :  { %v363_v1 = vpop.xlane.xlu0 %362 }
 0x48d   :  { %4342 = vrcp.f32 %v363_v1 }
 0x490   :  { %v366_v2 = vpop.xlane.xlu1 %365  ;;  %v372_v3 = vpop.permute.xlu0 %371 }
 0x491   :  { %4344 = vrcp.f32 %v366_v2  ;;  %4009 = vmatpush3.msra.mxu1 %v372_v3 }
 0x492   :  { %4013 = vmatprep.subr.mxu1 %v4432_v36 }
 0x494   :  { %v604_v8 = vpop.permute.xlu0 %603  ;;  %v602_v9 = vpop.permute.xlu1 %601 }
 0x497   :  { %v4343_v4 = vpop.eup %4342 }
 0x498   :  { %v369_v5 = vmul.f32 %v4343_v4, %v4339_v58  ;;  %v1025_v26 = vpop.permute.xlu1 %1024 }
 0x49a   :  { %4011 = vmatmul.mubr.msk.f32.vlgmr.msra.gmra.mrb[6].mxu1 %vm348_vm3, %v369_v5 }
 0x49b   :  { %v4345_v6 = vpop.eup %4344  ;;  %4014 = vmatpush3.msra.mxu1 %v448_v62  ;;  %4015 = vmatprep.mubr.msk.f32.mxu1 %vm4433_vm1, %v4432_v36 }
 0x49c   :  { %v370_v7 = vmul.f32 %v4345_v6, %v4341_v60  ;;  %4018 = vmatprep.subr.mxu1 %v4432_v36 }
 0x49e   :  { %4016 = vmatmul.mubr.msk.f32.vlgmr.msra.gmra.mrb[8].mxu1 %vm348_vm3, %v370_v7 }
 0x49f   :  { %4020 = vmatprep.mubr.msk.f32.mxu1 %vm4433_vm1, %v4432_v36 }
 0x4a2   :  { %4019 = vmatpush3.xpose.msk.msra.mxu1 %vm194_vm2, %v526_v63 }
 0x4a3   :  { %4023 = vmatprep.subr.mxu1 %v4432_v36 }
 0x4a5   :  { %4021 = vmatmul.mubr.msk.f32.vlgmr.msra.gmra.mrb[10].mxu1 %vm194_vm2, %v524_v0 }
 0x4a6   :  { %4024 = vmatpush3.xpose.msk.msra.mxu1 %vm194_vm2, %v604_v8  ;;  %4025 = vmatprep.mubr.msk.f32.mxu1 %vm4433_vm1, %v4432_v36  ;;  %v4690_v8 = vld [vmem:[%s5012_s5 + $0x8] sm:$0xff] }
 0x4a7   :  { %4033 = vmatprep.subr.mxu1 %v4432_v36 }
 0x4a9   :  { %4026 = vmatmul.mubr.msk.f32.vlgmr.msra.gmra.mrb[12].mxu1 %vm194_vm2, %v602_v9 }
 0x4aa   :  { %4035 = vmatprep.mubr.msk.f32.mxu1 %vm4433_vm1, %v4432_v36 }
 0x56d   :  { %v4623_v10 = vpop.f32.mrb[6].mxu1 }
 0x56e   :  { %v4012_v11 = vpop.f32.mrb[7].mxu1 }
 0x571   :  { %v4625_v12 = vpop.f32.mrb[8].mxu1 }
 0x572   :  { %v4017_v13 = vpop.f32.mrb[9].mxu1 }
 0x578   :  { %v597_v14 = vpop.f32.mrb[10].mxu1 }
 0x579   :  { %v4022_v15 = vpop.f32.mrb[11].mxu1  ;;  %v679_v25 = vsel %vm348_vm3, %v597_v14, -inf }
 0x57c   :  { %v675_v16 = vpop.f32.mrb[12].mxu1 }
 0x57d   :  { %v4027_v17 = vpop.f32.mrb[13].mxu1  ;;  %v682_v18 = vsel %vm348_vm3, %v675_v16, -inf }
 0x57e   :  { %683 = vmax.xlane.f32.xlu0 %v682_v18 }
 0x594   :  { %777 = vrot.lane.b32.xlu0 %v4569_v39, %s4439_s27 }
 0x598   :  { %1022 = vrot.lane.b32.xlu0 %v4577_v43, %s4440_s28 }
 0x59c   :  { %1100 = vrot.lane.b32.xlu0 %v4586_v45, %s4440_s28  ;;  %s4455_s28 = smov 100  }
 0x60b   :  { %v684_v19 = vpop.xlane.xlu0 %683 }
 0x60c   :  { %v686_v20 = vsub.f32 %v675_v16, %v684_v19 }
 0x60e   :  { %v689_v21 = vmul.f32 1.442695, %v686_v20 }
 0x60f   :  { %v778_v22 = vpop.permute.xlu0 %777 }
 0x610   :  { %4346 = vpow2.f32 %v689_v21  ;;  %4034 = vmatpush3.msra.mxu1 %v778_v22 }
 0x611   :  { %4048 = vmatprep.subr.mxu1 %v4432_v36 }
 0x613   :  { %v1023_v30 = vpop.permute.xlu0 %1022 }
 0x617   :  { %v1101_v32 = vpop.permute.xlu0 %1100 }
 0x61a   :  { %v4347_v23 = vpop.eup %4346 }
 0x61b   :  { %v694_v24 = vsel %vm348_vm3, %v4347_v23, 0.0 }
 0x61c   :  { %695 = vadd.xlane.f32.xlu1 %v694_v24 }
 0x62d   :  { %1102 = vrot.lane.b32.xlu1 %v4569_v39, %s4438_s26  ;;  %s4453_s26 = smov 40  }
 0x651   :  { %680 = vmax.xlane.f32.xlu1 %v679_v25 }
 0x6a9   :  { %v696_v27 = vpop.xlane.xlu1 %695 }
 0x6aa   :  { %4348 = vrcp.f32 %v696_v27 }
 0x6ad   :  { %v1103_v31 = vpop.permute.xlu1 %1102 }
 0x6b4   :  { %v4349_v28 = vpop.eup %4348 }
 0x6b5   :  { %v700_v29 = vmul.f32 %v4349_v28, %v4347_v23 }
 0x6b7   :  { %4036 = vmatmul.mubr.msk.f32.vlgmr.msra.gmra.mrb[14].mxu1 %vm348_vm3, %v700_v29 }
 0x6b8   :  { %4049 = vmatpush3.xpose.msk.msra.mxu1 %vm194_vm2, %v1025_v26  ;;  %4050 = vmatprep.mubr.msk.f32.mxu1 %vm4433_vm1, %v4432_v36 }
 0x6b9   :  { %4053 = vmatprep.subr.mxu1 %v4432_v36 }
 0x6bb   :  { %4051 = vmatmul.mubr.msk.f32.vlgmr.msra.gmra.mrb[16].mxu1 %vm194_vm2, %v1023_v30 }
 0x6bc   :  { %4054 = vmatpush3.xpose.msk.msra.mxu1 %vm194_vm2, %v1103_v31  ;;  %4055 = vmatprep.mubr.msk.f32.mxu1 %vm4433_vm1, %v4432_v36 }
 0x6bd   :  { %4063 = vmatprep.subr.mxu1 %v4432_v36 }
 0x6bf   :  { %4056 = vmatmul.mubr.msk.f32.vlgmr.msra.gmra.mrb[18].mxu1 %vm194_vm2, %v1101_v32 }
 0x6c0   :  { %4065 = vmatprep.mubr.msk.f32.mxu1 %vm4433_vm1, %v4432_v36 }
 0x6de   :  { %v681_v33 = vpop.xlane.xlu1 %680 }
 0x6df   :  { %v685_v34 = vsub.f32 %v597_v14, %v681_v33 }
 0x6e1   :  { %v687_v35 = vmul.f32 1.442695, %v685_v34 }
 0x6e3   :  { %4350 = vpow2.f32 %v687_v35 }
 0x6ed   :  { %v4351_v37 = vpop.eup %4350 }
 0x6ee   :  { %v691_v38 = vsel %vm348_vm3, %v4351_v37, 0.0 }
 0x6ef   :  { %692 = vadd.xlane.f32.xlu0 %v691_v38 }
 0x705   :  { %701 = vrot.lane.b32.xlu0 %v4571_v41, %s4439_s27  ;;  %s4454_s27 = smov 68  }
 0x709   :  { %1276 = vrot.lane.b32.xlu0 %v4569_v39, %s4441_s29 }
 0x70d   :  { %1440 = vrot.lane.b32.xlu0 %v4571_v41, %s4442_s30 }
 0x711   :  { %1438 = vrot.lane.b32.xlu0 %v4577_v43, %s4443_s14 }
 0x715   :  { %1518 = vrot.lane.b32.xlu0 %v4569_v39, %s4442_s30 }
 0x77c   :  { %v693_v40 = vpop.xlane.xlu0 %692 }
 0x77d   :  { %4352 = vrcp.f32 %v693_v40 }
 0x780   :  { %v702_v42 = vpop.permute.xlu0 %701 }
 0x781   :  { %4029 = vmatpush3.msra.mxu0 %v702_v42 }
 0x782   :  { %4038 = vmatprep.subr.msk.mxu0 %vm861_vm4, %v854_v57 }
 0x784   :  { %v1277_v44 = vpop.permute.xlu0 %1276 }
 0x785   :  { %4064 = vmatpush3.msra.mxu1 %v1277_v44 }
 0x786   :  { %4073 = vmatprep.subr.mxu1 %v4432_v36 }
 0x787   :  { %v4353_v46 = vpop.eup %4352 }
 0x788   :  { %v699_v47 = vmul.f32 %v4353_v46, %v4351_v37  ;;  %v1441_v13 = vpop.permute.xlu0 %1440 }
 0x78a   :  { %4031 = vmatmul.mubr.msk.f32.vlgmr.msra.gmra.mrb[0].mxu0 %vm348_vm3, %v699_v47  ;;  %v849_v48 = vpop.f32.mrb[14].mxu1 }
 0x78b   :  { %v4037_v49 = vpop.f32.mrb[15].mxu1  ;;  %4039 = vmatpush3.msk.msra.mxu0 %vm861_vm4, %v854_v57 }
 0x78c   :  { %4043 = vmatprep.subr.msk.mxu0 %vm861_vm4, %v187_v56  ;;  %v1439_v15 = vpop.permute.xlu0 %1438 }
 0x78e   :  { %v1096_v50 = vpop.f32.mrb[16].mxu1 }
 0x78f   :  { %v4052_v51 = vpop.f32.mrb[17].mxu1  ;;  %v1178_v52 = vsel %vm348_vm3, %v1096_v50, -inf }
 0x790   :  { %1179 = vmax.xlane.f32.xlu1 %v1178_v52  ;;  %v1519_v19 = vpop.permute.xlu0 %1518  ;;  %v1768_v52 = vrot.slane %v4690_v8, 4 }
 0x792   :  { %v1174_v53 = vpop.f32.mrb[18].mxu1 }
 0x793   :  { %v4057_v54 = vpop.f32.mrb[19].mxu1  ;;  %v1181_v55 = vsel %vm348_vm3, %v1174_v53, -inf }
 0x794   :  { %1182 = vmax.xlane.f32.xlu1 %v1181_v55 }
 0x81d   :  { %v1180_v58 = vpop.xlane.xlu1 %1179 }
 0x81e   :  { %v1184_v59 = vsub.f32 %v1096_v50, %v1180_v58 }
 0x820   :  { %v1186_v60 = vmul.f32 1.442695, %v1184_v59 }
 0x821   :  { %v1183_v61 = vpop.xlane.xlu1 %1182 }
 0x822   :  { %4354 = vpow2.f32 %v1186_v60  ;;  %v1185_v62 = vsub.f32 %v1174_v53, %v1183_v61 }
 0x824   :  { %v1188_v63 = vmul.f32 1.442695, %v1185_v62 }
 0x826   :  { %4356 = vpow2.f32 %v1188_v63 }
 0x82c   :  { %v4355_v0 = vpop.eup %4354 }
 0x82d   :  { %v1190_v1 = vsel %vm348_vm3, %v4355_v0, 0.0 }
 0x82e   :  { %1191 = vadd.xlane.f32.xlu1 %v1190_v1 }
 0x830   :  { %v4357_v2 = vpop.eup %4356 }
 0x831   :  { %v1193_v3 = vsel %vm348_vm3, %v4357_v2, 0.0 }
 0x832   :  { %1194 = vadd.xlane.f32.xlu1 %v1193_v3 }
 0x843   :  { %1200 = vrot.lane.b32.xlu1 %v4571_v41, %s4441_s29 }
 0x847   :  { %1516 = vrot.lane.b32.xlu1 %v4586_v45, %s4443_s14 }
 0x84b   :  { %1856 = vrot.lane.b32.xlu1 %v4571_v41, %s4444_s17 }
 0x85d   :  { %v773_v4 = vpop.f32.mrb[0].mxu0 }
 0x85e   :  { %v4032_v5 = vpop.f32.mrb[1].mxu0  ;;  %4040 = vmatprep.mubr.msk.f32.mxu0 %vm194_vm2, %v773_v4 }
 0x85f   :  { %4041 = vmatmul.mubr.msk.f32.vlgmr.msra.gmra.mrb[2].mxu0 %vm194_vm2, %v849_v48 }
 0x860   :  { %4045 = vmatprep.mubr.msk.f32.mxu0 %vm194_vm2, %v4623_v10  ;;  %4044 = vmatpush3.msk.msra.mxu0 %vm861_vm4, %v187_v56 }
 0x861   :  { %4058 = vmatprep.subr.mxu0 %v4432_v36 }
 0x867   :  { %4046 = vmatmul.mubr.msk.f32.vlgmr.msra.gmra.mrb[2].mxu0 %vm194_vm2, %v4625_v12 }
 0x868   :  { %4060 = vmatprep.mubr.msk.f32.mxu0 %vm4433_vm1, %v4432_v36 }
 0x8bb   :  { %v1192_v6 = vpop.xlane.xlu1 %1191 }
 0x8bc   :  { %4358 = vrcp.f32 %v1192_v6 }
 0x8bf   :  { %v1195_v7 = vpop.xlane.xlu1 %1194 }
 0x8c0   :  { %4360 = vrcp.f32 %v1195_v7 }
 0x8c3   :  { %v1201_v9 = vpop.permute.xlu1 %1200 }
 0x8c4   :  { %4059 = vmatpush3.msra.mxu0 %v1201_v9 }
 0x8c5   :  { %4068 = vmatprep.subr.msk.mxu0 %vm861_vm4, %v4690_v8 }
 0x8c6   :  { %v4359_v10 = vpop.eup %4358 }
 0x8c7   :  { %v1198_v11 = vmul.f32 %v4359_v10, %v4355_v0  ;;  %v1517_v21 = vpop.permute.xlu1 %1516 }
 0x8c9   :  { %4061 = vmatmul.mubr.msk.f32.vlgmr.msra.gmra.mrb[4].mxu0 %vm348_vm3, %v1198_v11 }
 0x8ca   :  { %v4361_v12 = vpop.eup %4360  ;;  %4069 = vmatpush3.msk.msra.mxu0 %vm861_vm4, %v4690_v8 }
 0x8cb   :  { %v1199_v14 = vmul.f32 %v4361_v12, %v4357_v2  ;;  %4078 = vmatprep.subr.mxu0 %v4432_v36  ;;  %v1857_v34 = vpop.permute.xlu1 %1856 }
 0x8cd   :  { %4066 = vmatmul.mubr.msk.f32.vlgmr.msra.gmra.mrb[20].mxu1 %vm348_vm3, %v1199_v14 }
 0x8ce   :  { %4074 = vmatpush3.xpose.msk.msra.mxu1 %vm194_vm2, %v1441_v13  ;;  %4075 = vmatprep.mubr.msk.f32.mxu1 %vm4433_vm1, %v4432_v36 }
 0x8cf   :  { %4083 = vmatprep.subr.mxu1 %v4432_v36 }
 0x8d1   :  { %4076 = vmatmul.mubr.msk.f32.vlgmr.msra.gmra.mrb[22].mxu1 %vm194_vm2, %v1439_v15  ;;  %v4770_v15 = vld [vmem:[%s5012_s5 + $0x10] sm:$0xff] }
 0x8d2   :  { %4085 = vmatprep.mubr.msk.f32.mxu1 %vm4433_vm1, %v4432_v36 }
 0x99c   :  { %v1272_v16 = vpop.f32.mrb[4].mxu0 }
 0x99d   :  { %v4062_v17 = vpop.f32.mrb[5].mxu0  ;;  %4070 = vmatprep.mubr.msk.f32.mxu0 %vm194_vm2, %v1272_v16 }
 0x9a0   :  { %v1348_v18 = vpop.f32.mrb[20].mxu1 }
 0x9a1   :  { %v4067_v20 = vpop.f32.mrb[21].mxu1  ;;  %4071 = vmatmul.mubr.msk.f32.vlgmr.msra.gmra.mrb[2].mxu0 %vm194_vm2, %v1348_v18 }
 0x9a2   :  { %4079 = vmatpush3.xpose.msk.msra.mxu0 %vm194_vm2, %v1519_v19  ;;  %4080 = vmatprep.mubr.msk.f32.mxu0 %vm4433_vm1, %v4432_v36 }
 0x9a3   :  { %4088 = vmatprep.subr.mxu0 %v4432_v36 }
 0x9a4   :  { %v1512_v22 = vpop.f32.mrb[22].mxu1 }
 0x9a5   :  { %v4077_v23 = vpop.f32.mrb[23].mxu1  ;;  %4081 = vmatmul.mubr.msk.f32.vlgmr.msra.gmra.mrb[6].mxu0 %vm194_vm2, %v1517_v21  ;;  %v1594_v24 = vsel %vm348_vm3, %v1512_v22, -inf }
 0x9a6   :  { %1595 = vmax.xlane.f32.xlu0 %v1594_v24  ;;  %4090 = vmatprep.mubr.msk.f32.mxu0 %vm4433_vm1, %v4432_v36 }
 0x9bc   :  { %1616 = vrot.lane.b32.xlu0 %v4571_v41, %s4445_s20 }
 0x9c0   :  { %1854 = vrot.lane.b32.xlu0 %v4577_v43, %s4446_s21 }
 0x9c4   :  { %1932 = vrot.lane.b32.xlu0 %v4586_v45, %s4446_s21 }
 0xa33   :  { %v1596_v25 = vpop.xlane.xlu0 %1595 }
 0xa34   :  { %v1600_v26 = vsub.f32 %v1512_v22, %v1596_v25 }
 0xa36   :  { %v1602_v27 = vmul.f32 1.442695, %v1600_v26 }
 0xa37   :  { %v1617_v28 = vpop.permute.xlu0 %1616 }
 0xa38   :  { %4362 = vpow2.f32 %v1602_v27  ;;  %4084 = vmatpush3.msra.mxu1 %v1617_v28 }
 0xa39   :  { %4098 = vmatprep.subr.mxu1 %v4432_v36 }
 0xa3b   :  { %v1855_v40 = vpop.permute.xlu0 %1854 }
 0xa3f   :  { %v1933_v44 = vpop.permute.xlu0 %1932 }
 0xa42   :  { %v4363_v29 = vpop.eup %4362 }
 0xa43   :  { %v1606_v30 = vsel %vm348_vm3, %v4363_v29, 0.0 }
 0xa44   :  { %1607 = vadd.xlane.f32.xlu1 %v1606_v30 }
 0xa55   :  { %1934 = vrot.lane.b32.xlu1 %v4569_v39, %s4444_s17 }
 0xa78   :  { %v1590_v31 = vpop.f32.mrb[6].mxu0 }
 0xa79   :  { %v4082_v32 = vpop.f32.mrb[7].mxu0  ;;  %v1597_v33 = vsel %vm348_vm3, %v1590_v31, -inf }
 0xa7a   :  { %1598 = vmax.xlane.f32.xlu1 %v1597_v33 }
 0xad1   :  { %v1608_v35 = vpop.xlane.xlu1 %1607 }
 0xad2   :  { %4364 = vrcp.f32 %v1608_v35 }
 0xad5   :  { %v1935_v42 = vpop.permute.xlu1 %1934 }
 0xadc   :  { %v4365_v37 = vpop.eup %4364 }
 0xadd   :  { %v1614_v38 = vmul.f32 %v4365_v37, %v4363_v29 }
 0xadf   :  { %4086 = vmatmul.mubr.msk.f32.vlgmr.msra.gmra.mrb[24].mxu1 %vm348_vm3, %v1614_v38 }
 0xae0   :  { %4099 = vmatpush3.xpose.msk.msra.mxu1 %vm194_vm2, %v1857_v34  ;;  %4100 = vmatprep.mubr.msk.f32.mxu1 %vm4433_vm1, %v4432_v36 }
 0xae1   :  { %4103 = vmatprep.subr.mxu1 %v4432_v36 }
 0xae3   :  { %4101 = vmatmul.mubr.msk.f32.vlgmr.msra.gmra.mrb[26].mxu1 %vm194_vm2, %v1855_v40 }
 0xae4   :  { %4104 = vmatpush3.xpose.msk.msra.mxu1 %vm194_vm2, %v1935_v42  ;;  %4105 = vmatprep.mubr.msk.f32.mxu1 %vm4433_vm1, %v4432_v36 }
 0xae5   :  { %4113 = vmatprep.subr.mxu1 %v4432_v36 }
 0xae7   :  { %4106 = vmatmul.mubr.msk.f32.vlgmr.msra.gmra.mrb[28].mxu1 %vm194_vm2, %v1933_v44 }
 0xae8   :  { %4115 = vmatprep.mubr.msk.f32.mxu1 %vm4433_vm1, %v4432_v36 }
 0xb07   :  { %v1599_v46 = vpop.xlane.xlu1 %1598 }
 0xb08   :  { %v1601_v47 = vsub.f32 %v1590_v31, %v1599_v46 }
 0xb0a   :  { %v1604_v48 = vmul.f32 1.442695, %v1601_v47 }
 0xb0c   :  { %4366 = vpow2.f32 %v1604_v48 }
 0xb16   :  { %v4367_v49 = vpop.eup %4366 }
 0xb17   :  { %v1609_v50 = vsel %vm348_vm3, %v4367_v49, 0.0 }
 0xb18   :  { %1610 = vadd.xlane.f32.xlu0 %v1609_v50 }
 0xb2e   :  { %1692 = vrot.lane.b32.xlu0 %v4569_v39, %s4445_s20 }
 0xb32   :  { %2108 = vrot.lane.b32.xlu0 %v4569_v39, %s4447_s3 }
 0xb36   :  { %2272 = vrot.lane.b32.xlu0 %v4571_v41, %s4448_s22 }
 0xb3a   :  { %2270 = vrot.lane.b32.xlu0 %v4577_v43, %s4449_s1 }
 0xb3e   :  { %2350 = vrot.lane.b32.xlu0 %v4569_v39, %s4448_s22 }
 0xba5   :  { %v1611_v51 = vpop.xlane.xlu0 %1610 }
 0xba6   :  { %4368 = vrcp.f32 %v1611_v51 }
 0xba9   :  { %v1693_v53 = vpop.permute.xlu0 %1692 }
 0xbaa   :  { %4089 = vmatpush3.msra.mxu0 %v1693_v53 }
 0xbab   :  { %4093 = vmatprep.subr.msk.mxu0 %vm861_vm4, %v1768_v52 }
 0xbad   :  { %v2109_v54 = vpop.permute.xlu0 %2108 }
 0xbae   :  { %4114 = vmatpush3.msra.mxu1 %v2109_v54 }
 0xbaf   :  { %4123 = vmatprep.subr.mxu1 %v4432_v36 }
 0xbb0   :  { %v4369_v55 = vpop.eup %4368 }
 0xbb1   :  { %v1615_v56 = vmul.f32 %v4369_v55, %v4367_v49  ;;  %v2273_v20 = vpop.permute.xlu0 %2272 }
 0xbb2   :  { %v1688_v57 = vpop.f32.mrb[24].mxu1 }
 0xbb3   :  { %v4087_v58 = vpop.f32.mrb[25].mxu1  ;;  %4091 = vmatmul.mubr.msk.f32.vlgmr.msra.gmra.mrb[8].mxu0 %vm348_vm3, %v1615_v56 }
 0xbb4   :  { %4095 = vmatprep.mubr.msk.f32.mxu0 %vm194_vm2, %v1688_v57  ;;  %4094 = vmatpush3.msk.msra.mxu0 %vm861_vm4, %v1768_v52 }
 0xbb5   :  { %4108 = vmatprep.subr.mxu0 %v4432_v36  ;;  %v2271_v22 = vpop.permute.xlu0 %2270 }
 0xbb6   :  { %v1928_v59 = vpop.f32.mrb[26].mxu1 }
 0xbb7   :  { %v4102_v60 = vpop.f32.mrb[27].mxu1  ;;  %v2010_v61 = vsel %vm348_vm3, %v1928_v59, -inf }
 0xbb8   :  { %2011 = vmax.xlane.f32.xlu1 %v2010_v61 }
 0xbb9   :  { %v2351_v26 = vpop.permute.xlu0 %2350 }
 0xbba   :  { %v2006_v62 = vpop.f32.mrb[28].mxu1 }
 0xbbb   :  { %v4107_v63 = vpop.f32.mrb[29].mxu1  ;;  %v2013_v0 = vsel %vm348_vm3, %v2006_v62, -inf }
 0xbbc   :  { %2014 = vmax.xlane.f32.xlu1 %v2013_v0 }
 0xc45   :  { %v2012_v1 = vpop.xlane.xlu1 %2011 }
 0xc46   :  { %v2016_v2 = vsub.f32 %v1928_v59, %v2012_v1  ;;  %v2600_v59 = vrot.slane %v4770_v15, 4 }
 0xc48   :  { %v2018_v3 = vmul.f32 1.442695, %v2016_v2 }
 0xc49   :  { %v2015_v4 = vpop.xlane.xlu1 %2014 }
 0xc4a   :  { %4370 = vpow2.f32 %v2018_v3  ;;  %v2017_v5 = vsub.f32 %v2006_v62, %v2015_v4 }
 0xc4c   :  { %v2020_v6 = vmul.f32 1.442695, %v2017_v5 }
 0xc4e   :  { %4372 = vpow2.f32 %v2020_v6 }
 0xc54   :  { %v4371_v7 = vpop.eup %4370 }
 0xc55   :  { %v2022_v8 = vsel %vm348_vm3, %v4371_v7, 0.0 }
 0xc56   :  { %2023 = vadd.xlane.f32.xlu1 %v2022_v8 }
 0xc58   :  { %v4373_v9 = vpop.eup %4372 }
 0xc59   :  { %v2025_v10 = vsel %vm348_vm3, %v4373_v9, 0.0 }
 0xc5a   :  { %2026 = vadd.xlane.f32.xlu1 %v2025_v10 }
 0xc6b   :  { %2032 = vrot.lane.b32.xlu1 %v4571_v41, %s4447_s3 }
 0xc6f   :  { %2348 = vrot.lane.b32.xlu1 %v4586_v45, %s4449_s1 }
 0xc73   :  { %2688 = vrot.lane.b32.xlu1 %v4571_v41, %s4450_s2 }
 0xc86   :  { %v1764_v11 = vpop.f32.mrb[8].mxu0 }
 0xc87   :  { %v4092_v12 = vpop.f32.mrb[9].mxu0  ;;  %4096 = vmatmul.mubr.msk.f32.vlgmr.msra.gmra.mrb[2].mxu0 %vm194_vm2, %v1764_v11 }
 0xc88   :  { %4110 = vmatprep.mubr.msk.f32.mxu0 %vm4433_vm1, %v4432_v36 }
 0xce3   :  { %v2024_v13 = vpop.xlane.xlu1 %2023 }
 0xce4   :  { %4374 = vrcp.f32 %v2024_v13 }
 0xce7   :  { %v2027_v14 = vpop.xlane.xlu1 %2026 }
 0xce8   :  { %4376 = vrcp.f32 %v2027_v14 }
 0xceb   :  { %v2033_v16 = vpop.permute.xlu1 %2032 }
 0xcec   :  { %4109 = vmatpush3.msra.mxu0 %v2033_v16 }
 0xced   :  { %4118 = vmatprep.subr.msk.mxu0 %vm861_vm4, %v4770_v15 }
 0xcee   :  { %v4375_v17 = vpop.eup %4374 }
 0xcef   :  { %v2030_v18 = vmul.f32 %v4375_v17, %v4371_v7  ;;  %v2349_v28 = vpop.permute.xlu1 %2348 }
 0xcf1   :  { %4111 = vmatmul.mubr.msk.f32.vlgmr.msra.gmra.mrb[10].mxu0 %vm348_vm3, %v2030_v18 }
 0xcf2   :  { %v4377_v19 = vpop.eup %4376  ;;  %4119 = vmatpush3.msk.msra.mxu0 %vm861_vm4, %v4770_v15 }
 0xcf3   :  { %v2031_v21 = vmul.f32 %v4377_v19, %v4373_v9  ;;  %4128 = vmatprep.subr.mxu0 %v4432_v36  ;;  %v2689_v46 = vpop.permute.xlu1 %2688 }
 0xcf5   :  { %4116 = vmatmul.mubr.msk.f32.vlgmr.msra.gmra.mrb[30].mxu1 %vm348_vm3, %v2031_v21  ;;  %v4848_v21 = vld [vmem:[%s5012_s5 + $0x18] sm:$0xff]  ;;  %s4456_s5 = smov 36  }
 0xcf6   :  { %4124 = vmatpush3.xpose.msk.msra.mxu1 %vm194_vm2, %v2273_v20  ;;  %4125 = vmatprep.mubr.msk.f32.mxu1 %vm4433_vm1, %v4432_v36 }
 0xcf7   :  { %4133 = vmatprep.subr.mxu1 %v4432_v36 }
 0xcf9   :  { %4126 = vmatmul.mubr.msk.f32.vlgmr.msra.gmra.mrb[32].mxu1 %vm194_vm2, %v2271_v22 }
 0xcfa   :  { %4135 = vmatprep.mubr.msk.f32.mxu1 %vm4433_vm1, %v4432_v36 }
 0xdc4   :  { %v2104_v23 = vpop.f32.mrb[10].mxu0 }
 0xdc5   :  { %v4112_v24 = vpop.f32.mrb[11].mxu0  ;;  %4120 = vmatprep.mubr.msk.f32.mxu0 %vm194_vm2, %v2104_v23 }
 0xdc8   :  { %v2180_v25 = vpop.f32.mrb[30].mxu1 }
 0xdc9   :  { %v4117_v27 = vpop.f32.mrb[31].mxu1  ;;  %4121 = vmatmul.mubr.msk.f32.vlgmr.msra.gmra.mrb[2].mxu0 %vm194_vm2, %v2180_v25 }
 0xdca   :  { %4129 = vmatpush3.xpose.msk.msra.mxu0 %vm194_vm2, %v2351_v26  ;;  %4130 = vmatprep.mubr.msk.f32.mxu0 %vm4433_vm1, %v4432_v36 }
 0xdcb   :  { %4138 = vmatprep.subr.mxu0 %v4432_v36 }
 0xdcc   :  { %v2344_v29 = vpop.f32.mrb[32].mxu1 }
 0xdcd   :  { %v4127_v30 = vpop.f32.mrb[33].mxu1  ;;  %4131 = vmatmul.mubr.msk.f32.vlgmr.msra.gmra.mrb[12].mxu0 %vm194_vm2, %v2349_v28  ;;  %v2426_v31 = vsel %vm348_vm3, %v2344_v29, -inf }
 0xdce   :  { %2427 = vmax.xlane.f32.xlu0 %v2426_v31  ;;  %4140 = vmatprep.mubr.msk.f32.mxu0 %vm4433_vm1, %v4432_v36 }
 0xde4   :  { %2448 = vrot.lane.b32.xlu0 %v4571_v41, %s4451_s24 }
 0xde8   :  { %2686 = vrot.lane.b32.xlu0 %v4577_v43, %s4452_s25 }
 0xdec   :  { %2764 = vrot.lane.b32.xlu0 %v4586_v45, %s4452_s25 }
 0xe5b   :  { %v2428_v32 = vpop.xlane.xlu0 %2427 }
 0xe5c   :  { %v2432_v33 = vsub.f32 %v2344_v29, %v2428_v32 }
 0xe5e   :  { %v2434_v34 = vmul.f32 1.442695, %v2432_v33 }
 0xe5f   :  { %v2449_v35 = vpop.permute.xlu0 %2448 }
 0xe60   :  { %4378 = vpow2.f32 %v2434_v34  ;;  %4134 = vmatpush3.msra.mxu1 %v2449_v35 }
 0xe61   :  { %4148 = vmatprep.subr.mxu1 %v4432_v36 }
 0xe63   :  { %v2687_v50 = vpop.permute.xlu0 %2686 }
 0xe67   :  { %v2765_v52 = vpop.permute.xlu0 %2764 }
 0xe6a   :  { %v4379_v37 = vpop.eup %4378 }
 0xe6b   :  { %v2438_v38 = vsel %vm348_vm3, %v4379_v37, 0.0 }
 0xe6c   :  { %2439 = vadd.xlane.f32.xlu1 %v2438_v38 }
 0xe7d   :  { %2766 = vrot.lane.b32.xlu1 %v4569_v39, %s4450_s2 }
 0xea0   :  { %v2422_v40 = vpop.f32.mrb[12].mxu0 }
 0xea1   :  { %v4132_v42 = vpop.f32.mrb[13].mxu0  ;;  %v2429_v44 = vsel %vm348_vm3, %v2422_v40, -inf }
 0xea2   :  { %2430 = vmax.xlane.f32.xlu1 %v2429_v44 }
 0xef9   :  { %v2440_v47 = vpop.xlane.xlu1 %2439 }
 0xefa   :  { %4380 = vrcp.f32 %v2440_v47 }
 0xefd   :  { %v2767_v51 = vpop.permute.xlu1 %2766 }
 0xf04   :  { %v4381_v48 = vpop.eup %4380 }
 0xf05   :  { %v2446_v49 = vmul.f32 %v4381_v48, %v4379_v37 }
 0xf07   :  { %4136 = vmatmul.mubr.msk.f32.vlgmr.msra.gmra.mrb[34].mxu1 %vm348_vm3, %v2446_v49 }
 0xf08   :  { %4149 = vmatpush3.xpose.msk.msra.mxu1 %vm194_vm2, %v2689_v46  ;;  %4150 = vmatprep.mubr.msk.f32.mxu1 %vm4433_vm1, %v4432_v36 }
 0xf09   :  { %4153 = vmatprep.subr.mxu1 %v4432_v36 }
 0xf0b   :  { %4151 = vmatmul.mubr.msk.f32.vlgmr.msra.gmra.mrb[36].mxu1 %vm194_vm2, %v2687_v50 }
 0xf0c   :  { %4154 = vmatpush3.xpose.msk.msra.mxu1 %vm194_vm2, %v2767_v51  ;;  %4155 = vmatprep.mubr.msk.f32.mxu1 %vm4433_vm1, %v4432_v36 }
 0xf0d   :  { %4163 = vmatprep.subr.mxu1 %v4432_v36 }
 0xf0f   :  { %4156 = vmatmul.mubr.msk.f32.vlgmr.msra.gmra.mrb[38].mxu1 %vm194_vm2, %v2765_v52 }
 0xf10   :  { %4165 = vmatprep.mubr.msk.f32.mxu1 %vm4433_vm1, %v4432_v36 }
 0xf2f   :  { %v2431_v53 = vpop.xlane.xlu1 %2430 }
 0xf30   :  { %v2433_v54 = vsub.f32 %v2422_v40, %v2431_v53 }
 0xf32   :  { %v2436_v55 = vmul.f32 1.442695, %v2433_v54 }
 0xf34   :  { %4382 = vpow2.f32 %v2436_v55 }
 0xf3e   :  { %v4383_v56 = vpop.eup %4382 }
 0xf3f   :  { %v2441_v57 = vsel %vm348_vm3, %v4383_v56, 0.0 }
 0xf40   :  { %2442 = vadd.xlane.f32.xlu0 %v2441_v57 }
 0xf56   :  { %2524 = vrot.lane.b32.xlu0 %v4569_v39, %s4451_s24 }
 0xf5a   :  { %2940 = vrot.lane.b32.xlu0 %v4569_v39, %s4453_s26 }
 0xf5e   :  { %3104 = vrot.lane.b32.xlu0 %v4571_v41, %s4454_s27 }
 0xf62   :  { %3182 = vrot.lane.b32.xlu0 %v4569_v39, %s4454_s27 }
 0xf66   :  { %3102 = vrot.lane.b32.xlu0 %v4577_v43, %s4455_s28 }
 0xfcd   :  { %v2443_v58 = vpop.xlane.xlu0 %2442 }
 0xfce   :  { %4384 = vrcp.f32 %v2443_v58 }
 0xfd1   :  { %v2525_v60 = vpop.permute.xlu0 %2524 }
 0xfd2   :  { %4139 = vmatpush3.msra.mxu0 %v2525_v60 }
 0xfd3   :  { %4143 = vmatprep.subr.msk.mxu0 %vm861_vm4, %v2600_v59 }
 0xfd5   :  { %v2941_v61 = vpop.permute.xlu0 %2940 }
 0xfd6   :  { %4164 = vmatpush3.msra.mxu1 %v2941_v61 }
 0xfd7   :  { %4173 = vmatprep.subr.mxu1 %v4432_v36 }
 0xfd8   :  { %v4385_v62 = vpop.eup %4384 }
 0xfd9   :  { %v2447_v63 = vmul.f32 %v4385_v62, %v4383_v56  ;;  %v3105_v23 = vpop.permute.xlu0 %3104 }
 0xfda   :  { %v2520_v0 = vpop.f32.mrb[34].mxu1 }
 0xfdb   :  { %v4137_v1 = vpop.f32.mrb[35].mxu1  ;;  %4141 = vmatmul.mubr.msk.f32.vlgmr.msra.gmra.mrb[14].mxu0 %vm348_vm3, %v2447_v63 }
 0xfdc   :  { %4145 = vmatprep.mubr.msk.f32.mxu0 %vm194_vm2, %v2520_v0  ;;  %4144 = vmatpush3.msk.msra.mxu0 %vm861_vm4, %v2600_v59 }
 0xfdd   :  { %4158 = vmatprep.subr.mxu0 %v4432_v36  ;;  %v3183_v26 = vpop.permute.xlu0 %3182 }
 0xfde   :  { %v2760_v43 = vpop.f32.mrb[36].mxu1 }
 0xfdf   :  { %v4152_v2 = vpop.f32.mrb[37].mxu1  ;;  %v2842_v3 = vsel %vm348_vm3, %v2760_v43, -inf }
 0xfe0   :  { %2843 = vmax.xlane.f32.xlu1 %v2842_v3  ;;  %v4406_v2 = vld [vmem:[%s5007_s0 + $0x8] sm:$0xff] }
 0xfe1   :  { %v3103_v28 = vpop.permute.xlu0 %3102 }
 0xfe2   :  { %v2838_v4 = vpop.f32.mrb[38].mxu1 }
 0xfe3   :  { %v4157_v5 = vpop.f32.mrb[39].mxu1  ;;  %v2845_v6 = vsel %vm348_vm3, %v2838_v4, -inf }
 0xfe4   :  { %2846 = vmax.xlane.f32.xlu1 %v2845_v6  ;;  %v4407_v5 = vld [vmem:[%s5007_s0] sm:$0xff] }
0x106d   :  { %v2844_v7 = vpop.xlane.xlu1 %2843 }
0x106e   :  { %v2848_v8 = vsub.f32 %v2760_v43, %v2844_v7  ;;  %v3862_v43 = vld [vmem:[%s5013_s6] ss:$0 sm:$0xff] }
0x1070   :  { %v2850_v9 = vmul.f32 1.442695, %v2848_v8 }
0x1071   :  { %v2847_v10 = vpop.xlane.xlu1 %2846 }
0x1072   :  { %4386 = vpow2.f32 %v2850_v9  ;;  %v2849_v11 = vsub.f32 %v2838_v4, %v2847_v10 }
0x1074   :  { %v2852_v12 = vmul.f32 1.442695, %v2849_v11 }
0x1076   :  { %4388 = vpow2.f32 %v2852_v12 }
0x107c   :  { %v4387_v13 = vpop.eup %4386 }
0x107d   :  { %v2854_v14 = vsel %vm348_vm3, %v4387_v13, 0.0 }
0x107e   :  { %2855 = vadd.xlane.f32.xlu1 %v2854_v14 }
0x1080   :  { %v4389_v15 = vpop.eup %4388 }
0x1081   :  { %v2857_v16 = vsel %vm348_vm3, %v4389_v15, 0.0 }
0x1082   :  { %2858 = vadd.xlane.f32.xlu1 %v2857_v16 }
0x1093   :  { %2864 = vrot.lane.b32.xlu1 %v4571_v41, %s4453_s26 }
0x1097   :  { %3180 = vrot.lane.b32.xlu1 %v4586_v45, %s4455_s28 }
0x10ae   :  { %v2596_v17 = vpop.f32.mrb[14].mxu0 }
0x10af   :  { %v4142_v18 = vpop.f32.mrb[15].mxu0  ;;  %4146 = vmatmul.mubr.msk.f32.vlgmr.msra.gmra.mrb[2].mxu0 %vm194_vm2, %v2596_v17 }
0x10b0   :  { %4160 = vmatprep.mubr.msk.f32.mxu0 %vm4433_vm1, %v4432_v36 }
0x110b   :  { %v2856_v19 = vpop.xlane.xlu1 %2855 }
0x110c   :  { %4390 = vrcp.f32 %v2856_v19 }
0x110f   :  { %v2859_v20 = vpop.xlane.xlu1 %2858 }
0x1110   :  { %4392 = vrcp.f32 %v2859_v20 }
0x1113   :  { %v2865_v22 = vpop.permute.xlu1 %2864 }
0x1114   :  { %4159 = vmatpush3.msra.mxu0 %v2865_v22  ;;  %v3574_v22 = vld [vmem:[%s5016_s9 + $0x8] sm:$0xff] }
0x1115   :  { %4168 = vmatprep.subr.msk.mxu0 %vm861_vm4, %v4848_v21 }
0x1116   :  { %v4391_v45 = vpop.eup %4390 }
0x1117   :  { %v2862_v24 = vmul.f32 %v4391_v45, %v4387_v13  ;;  %v3181_v33 = vpop.permute.xlu1 %3180  ;;  %v3575_v45 = vld [vmem:[%s5016_s9 + $0x10] sm:$0xff] }
0x1119   :  { %4161 = vmatmul.mubr.msk.f32.vlgmr.msra.gmra.mrb[16].mxu0 %vm348_vm3, %v2862_v24  ;;  %v3576_v24 = vld [vmem:[%s5016_s9 + $0x18] sm:$0xff] }
0x111a   :  { %v4393_v25 = vpop.eup %4392  ;;  %4169 = vmatpush3.msk.msra.mxu0 %vm861_vm4, %v4848_v21 }
0x111b   :  { %v2863_v27 = vmul.f32 %v4393_v25, %v4389_v15  ;;  %4178 = vmatprep.subr.mxu0 %v4432_v36  ;;  %v4256_v25 = vpack.c.bf16 %v3576_v24, %v3575_v45 }
0x111d   :  { %4166 = vmatmul.mubr.msk.f32.vlgmr.msra.gmra.mrb[40].mxu1 %vm348_vm3, %v2863_v27  ;;  %v3668_v27 = vld [vmem:[%s5018_s11 + $0x8] sm:$0xff] }
0x111e   :  { %4174 = vmatpush3.xpose.msk.msra.mxu1 %vm194_vm2, %v3105_v23  ;;  %4175 = vmatprep.mubr.msk.f32.mxu1 %vm4433_vm1, %v4432_v36 }
0x111f   :  { %4183 = vmatprep.subr.mxu1 %v4432_v36 }
0x1121   :  { %4176 = vmatmul.mubr.msk.f32.vlgmr.msra.gmra.mrb[42].mxu1 %vm194_vm2, %v3103_v28  ;;  %v3669_v28 = vld [vmem:[%s5018_s11 + $0x10] sm:$0xff] }
0x1122   :  { %4185 = vmatprep.mubr.msk.f32.mxu1 %vm4433_vm1, %v4432_v36 }
0x11ec   :  { %v2936_v29 = vpop.f32.mrb[16].mxu0 }
0x11ed   :  { %v4162_v30 = vpop.f32.mrb[17].mxu0  ;;  %4170 = vmatprep.mubr.msk.f32.mxu0 %vm194_vm2, %v2936_v29 }
0x11ee   :  { %v3670_v30 = vld [vmem:[%s5018_s11 + $0x18] sm:$0xff] }
0x11f0   :  { %v3012_v31 = vpop.f32.mrb[40].mxu1 }
0x11f1   :  { %v4167_v32 = vpop.f32.mrb[41].mxu1  ;;  %4171 = vmatmul.mubr.msk.f32.vlgmr.msra.gmra.mrb[2].mxu0 %vm194_vm2, %v3012_v31  ;;  %v4264_v31 = vpack.c.bf16 %v3670_v30, %v3669_v28 }
0x11f2   :  { %4179 = vmatpush3.xpose.msk.msra.mxu0 %vm194_vm2, %v3183_v26  ;;  %4180 = vmatprep.mubr.msk.f32.mxu0 %vm4433_vm1, %v4432_v36  ;;  %v3667_v26 = vld [vmem:[%s5018_s11] sm:$0xff] }
0x11f3   :  { %4188 = vmatprep.subr.mxu0 %v4432_v36  ;;  %v4260_v29 = vpack.c.bf16 %v3668_v27, %v3667_v26  ;;  %v3671_v32 = vld [vmem:[%s5018_s11 + $0x20] sm:$0xff] }
0x11f4   :  { %v3176_v34 = vpop.f32.mrb[42].mxu1 }
0x11f5   :  { %v4177_v35 = vpop.f32.mrb[43].mxu1  ;;  %4181 = vmatmul.mubr.msk.f32.vlgmr.msra.gmra.mrb[18].mxu0 %vm194_vm2, %v3181_v33  ;;  %v3258_v37 = vsel %vm348_vm3, %v3176_v34, -inf  ;;  %v3672_v33 = vld [vmem:[%s5018_s11 + $0x28] sm:$0xff] }
0x11f6   :  { %3259 = vmax.xlane.f32.xlu0 %v3258_v37  ;;  %4190 = vmatprep.mubr.msk.f32.mxu0 %vm4433_vm1, %v4432_v36  ;;  %v3432_v36 = vrot.slane %v4848_v21, 4  ;;  %v3573_v21 = vld [vmem:[%s5016_s9] sm:$0xff]  ;;  %v3673_v35 = vld [vmem:[%s5018_s11 + $0x30] sm:$0xff]  ;;  %v3674_v37 = vld [vmem:[%s5018_s11 + $0x38] sm:$0xff] }
0x11f7   :  { %v4252_v23 = vpack.c.bf16 %v3574_v22, %v3573_v21 }
0x1283   :  { %v3260_v38 = vpop.xlane.xlu0 %3259 }
0x1284   :  { %v3264_v40 = vsub.f32 %v3176_v34, %v3260_v38  ;;  %v4268_v34 = vpack.c.bf16 %v3672_v33, %v3671_v32  ;;  %v4272_v38 = vpack.c.bf16 %v3674_v37, %v3673_v35 }
0x1286   :  { %v3266_v42 = vmul.f32 1.442695, %v3264_v40  ;;  %v3675_v40 = vld [vmem:[%s5018_s11 + $0x40] sm:$0xff] }
0x1288   :  { %4394 = vpow2.f32 %v3266_v42  ;;  %v3676_v42 = vld [vmem:[%s5018_s11 + $0x48] sm:$0xff] }
0x1292   :  { %v4395_v44 = vpop.eup %4394 }
0x1293   :  { %v3270_v46 = vsel %vm348_vm3, %v4395_v44, 0.0 }
0x1294   :  { %3271 = vadd.xlane.f32.xlu0 %v3270_v46  ;;  %v3677_v46 = vld [vmem:[%s5018_s11 + $0x50] sm:$0xff] }
0x12c8   :  { %v3254_v47 = vpop.f32.mrb[18].mxu0 }
0x12c9   :  { %v4182_v48 = vpop.f32.mrb[19].mxu0  ;;  %v3261_v49 = vsel %vm348_vm3, %v3254_v47, -inf }
0x12ca   :  { %3262 = vmax.xlane.f32.xlu1 %v3261_v49  ;;  %v3679_v49 = vld [vmem:[%s5018_s11 + $0x60] sm:$0xff] }
0x12db   :  { %3356 = vrot.lane.b32.xlu1 %v4569_v39, %s4456_s5 }
0x1321   :  { %v3272_v56 = vpop.xlane.xlu0 %3271 }
0x1357   :  { %v3263_v50 = vpop.xlane.xlu1 %3262 }
0x1358   :  { %v3265_v51 = vsub.f32 %v3254_v47, %v3263_v50  ;;  %v3678_v47 = vld [vmem:[%s5018_s11 + $0x58] sm:$0xff]  ;;  %v3680_v50 = vld [vmem:[%s5018_s11 + $0x68] sm:$0xff] }
0x1359   :  { %v4280_v48 = vpack.c.bf16 %v3678_v47, %v3677_v46 }
0x135a   :  { %v3268_v52 = vmul.f32 1.442695, %v3265_v51  ;;  %v4284_v51 = vpack.c.bf16 %v3680_v50, %v3679_v49 }
0x135b   :  { %v3357_v53 = vpop.permute.xlu1 %3356 }
0x135c   :  { %4396 = vpow2.f32 %v3268_v52  ;;  %4189 = vmatpush3.msra.mxu0 %v3357_v53 }
0x135d   :  { %4193 = vmatprep.subr.msk.mxu0 %vm861_vm4, %v3432_v36  ;;  %4398 = vrcp.f32 %v3272_v56 }
0x1366   :  { %v4397_v54 = vpop.eup %4396 }
0x1367   :  { %v3273_v55 = vsel %vm348_vm3, %v4397_v54, 0.0  ;;  %v4399_v39 = vpop.eup %4398 }
0x1368   :  { %3274 = vadd.xlane.f32.xlu0 %v3273_v55  ;;  %v3278_v58 = vmul.f32 %v4399_v39, %v4395_v44  ;;  %v4276_v44 = vpack.c.bf16 %v3676_v42, %v3675_v40  ;;  %v3863_v39 = vld [vmem:[%s5014_s7] ss:$0 sm:$0xff] }
0x137e   :  { %3280 = vrot.lane.b32.xlu0 %v4571_v41, %s4456_s5 }
0x13f5   :  { %v3275_v57 = vpop.xlane.xlu0 %3274 }
0x13f6   :  { %4400 = vrcp.f32 %v3275_v57 }
0x13f9   :  { %v3281_v59 = vpop.permute.xlu0 %3280 }
0x13fa   :  { %4184 = vmatpush3.msra.mxu1 %v3281_v59 }
0x13fb   :  { %4186 = vmatmul.mubr.msk.f32.vlgmr.msra.gmra.mrb[44].mxu1 %vm348_vm3, %v3278_v58  ;;  %4253 = vmatprep.subr.bf16.mxu1 %v4252_v23 }
0x13fc   :  { %4255 = vmatpush3.bf16.msra.mxu1 %v4252_v23 }
0x13fd   :  { %4257 = vmatprep.subr.bf16.mxu1 %v4256_v25 }
0x1400   :  { %v4401_v60 = vpop.eup %4400  ;;  %4259 = vmatpush3.bf16.msra.mxu1 %v4256_v25 }
0x1401   :  { %v3279_v61 = vmul.f32 %v4401_v60, %v4397_v54 }
0x1403   :  { %4191 = vmatmul.mubr.msk.f32.vlgmr.msra.gmra.mrb[20].mxu0 %vm348_vm3, %v3279_v61  ;;  %v3864_v61 = vld [vmem:[%s5015_s8] ss:$0 sm:$0xff] }
0x1404   :  { %4194 = vmatpush3.msk.msra.mxu0 %vm861_vm4, %v3432_v36 }
0x1405   :  { %4261 = vmatprep.subr.bf16.mxu0 %v4260_v29 }
0x14ce   :  { %v3352_v62 = vpop.f32.mrb[44].mxu1 }
0x14cf   :  { %v4187_v63 = vpop.f32.mrb[45].mxu1  ;;  %4195 = vmatprep.mubr.msk.f32.mxu0 %vm194_vm2, %v3352_v62 }
0x14d6   :  { %v3428_v41 = vpop.f32.mrb[20].mxu0 }
0x14d7   :  { %v4192_v0 = vpop.f32.mrb[21].mxu0  ;;  %4196 = vmatmul.mubr.msk.f32.vlgmr.msra.gmra.mrb[2].mxu0 %vm194_vm2, %v3428_v41 }
0x14d8   :  { %4263 = vmatpush3.bf16.msra.mxu0 %v4260_v29 }
0x14d9   :  { %4265 = vmatprep.subr.bf16.mxu0 %v4264_v31 }
0x14dc   :  { %4267 = vmatpush3.bf16.msra.mxu0 %v4264_v31 }
0x14dd   :  { %4269 = vmatprep.subr.bf16.mxu0 %v4268_v34 }
0x14e0   :  { %4271 = vmatpush3.bf16.msra.mxu0 %v4268_v34 }
0x14e1   :  { %4273 = vmatprep.subr.bf16.mxu0 %v4272_v38 }
0x14e4   :  { %4275 = vmatpush3.bf16.msra.mxu0 %v4272_v38 }
0x14e5   :  { %4277 = vmatprep.subr.bf16.mxu0 %v4276_v44 }
0x14e8   :  { %4279 = vmatpush3.bf16.msra.mxu0 %v4276_v44 }
0x14e9   :  { %4281 = vmatprep.subr.bf16.mxu0 %v4280_v48 }
0x14ec   :  { %4283 = vmatpush3.bf16.msra.mxu0 %v4280_v48 }
0x14ed   :  { %4285 = vmatprep.subr.bf16.mxu0 %v4284_v51 }
0x14f0   :  { %4287 = vmatpush3.bf16.msra.mxu0 %v4284_v51 }
0x15aa   :  { %v4197_v1 = vpop.f32.mrb[2].mxu0 }
0x15ab   :  { %v3519_v3 = vadd.f32 %v4406_v2, %v4197_v1  ;;  %v3507_v4 = vpop.f32.mrb[3].mxu0  ;;  %v3681_v1 = vld [vmem:[%s5018_s11 + $0x70] sm:$0xff] }
0x15ac   :  { %v3518_v6 = vadd.f32 %v4407_v5, %v3507_v4 }
0x15ad   :  { %v4895_v7 = vadd.f32 %v3862_v43, %v3519_v3  ;;  %v3865_v3 = vld [vmem:[%s5017_s10] ss:$0 sm:$0xff] }
0x15ae   :  { %v4897_v8 = vadd.f32 %v3862_v43, %v3518_v6  ;;  %v3682_v43 = vld [vmem:[%s5018_s11 + $0x78] sm:$0xff]  ;;  %s4457_s11 = smov [#allocation2]  }
0x15af   :  { %v3534_v9 = vsel %vm49_vm0, %v4895_v7, 0.0  ;;  %v4288_v2 = vpack.c.bf16 %v3682_v43, %v3681_v1  ;;  %s3774_s16 = sshll.u32 %s4457_s11, 4  ;;  %s3775_s16 = int_to_ptr.vmem [resolvable:$true] %s3774_s16 }
0x15b0   :  { %3535 = vadd.xlane.f32.xlu0 %v3534_v9  ;;  %v3531_v10 = vsel %vm49_vm0, %v4897_v8, 0.0  ;;  %s4408_s10 = scalar_lea.vmem %s3775_s16, 256  ;;  %p4413_p1 = scmp.lt.s32.totalorder %s3775_s16, %s3775_s16 }
0x15b1   :  { %3532 = vadd.xlane.f32.xlu1 %v3531_v10  ;;  %4289 = vmatprep.subr.bf16.mxu0 %v4288_v2  ;;  %p4409_p0 = scmp.ne.s32.totalorder %s3775_s16, %s4408_s10  ;;  %p4414_p2 = scmp.lt.s32.totalorder %s4408_s10, %s4408_s10 }
0x15b2   :  { %4291 = vmatpush3.bf16.msra.mxu0 %v4288_v2 }
0x15b3   :  { %p4415_p3 = por %p4414_p2, %p4413_p1 }
0x15b5   :  { %p4416_p4 = pnand %p4415_p3, %p4409_p0 }
0x163d   :  { %v3536_v11 = vpop.xlane.xlu0 %3535 }
0x163e   :  { %v3538_v12 = vmul.f32 0.03125, %v3536_v11  ;;  %v3533_v13 = vpop.xlane.xlu1 %3532 }
0x163f   :  { %v3537_v14 = vmul.f32 0.03125, %v3533_v13 }
0x1640   :  { %v4904_v15 = vsub.f32 %v4895_v7, %v3538_v12  ;;  %v3868_v12 = vld [vmem:[%s5019_s12] ss:$0 sm:$0xff] }
0x1641   :  { %v4907_v16 = vsub.f32 %v4897_v8, %v3537_v14 }
0x1642   :  { %v3542_v17 = vmul.f32 %v4904_v15, %v4904_v15 }
0x1643   :  { %v3541_v18 = vmul.f32 %v4907_v16, %v4907_v16 }
0x1644   :  { %v3546_v19 = vsel %vm49_vm0, %v3542_v17, 0.0 }
0x1645   :  { %3547 = vadd.xlane.f32.xlu1 %v3546_v19  ;;  %v3543_v20 = vsel %vm49_vm0, %v3541_v18, 0.0 }
0x1646   :  { %3544 = vadd.xlane.f32.xlu0 %v3543_v20 }
0x16d2   :  { %v3548_v36 = vpop.xlane.xlu1 %3547 }
0x16d3   :  { %v3550_v52 = vmul.f32 0.03125, %v3548_v36  ;;  %v3545_v53 = vpop.xlane.xlu0 %3544 }
0x16d4   :  { %v3549_v54 = vmul.f32 0.03125, %v3545_v53 }
0x16d5   :  { %v3552_v55 = vadd.f32 1e-05, %v3550_v52 }
0x16d6   :  { %v3551_v56 = vadd.f32 1e-05, %v3549_v54 }
0x16d7   :  { %4402 = vrsqrt.f32 %v3552_v55 }
0x16d8   :  { %4404 = vrsqrt.f32 %v3551_v56 }
0x16e1   :  { %v4403_v57 = vpop.eup %4402 }
0x16e2   :  { %v4405_v58 = vpop.eup %4404  ;;  %v3556_v59 = vmul.f32 %v4403_v57, %v4904_v15 }
0x16e3   :  { %v3555_v60 = vmul.f32 %v4405_v58, %v4907_v16 }
0x16e4   :  { %v3564_v62 = vmul.f32 %v3863_v39, %v3556_v59 }
0x16e5   :  { %v3563_v63 = vmul.f32 %v3863_v39, %v3555_v60 }
0x16e6   :  { %v3572_v0 = vadd.f32 %v3864_v61, %v3564_v62 }
0x16e7   :  { %v3571_v41 = vadd.f32 %v3864_v61, %v3563_v63 }
0x16e9   :  { %4206 = vmatprep.mubr.msk.f32.mxu1 %vm49_vm0, %v3571_v41 }
0x16ea   :  { %4207 = vmatmul.mubr.msk.f32.vlgmr.msra.gmra.mrb[46].mxu1 %vm49_vm0, %v3572_v0 }
0x17bd   :  { %v4208_v4 = vpop.f32.mrb[46].mxu1 }
0x17be   :  { %v3662_v5 = vadd.f32 %v4208_v4, %v3865_v3  ;;  %v3656_v6 = vpop.f32.mrb[47].mxu1 }
0x17bf   :  { %v3657_v9 = vadd.f32 %v3865_v3, %v3656_v6 }
0x17c0   :  { %v3666_v11 = vmax.f32 %v3662_v5, 0.0 }
0x17c1   :  { %v3665_v10 = vmax.f32 %v3657_v9, 0.0 }
0x17c3   :  { %4241 = vmatprep.mubr.f32.mxu0 %v3665_v10 }
0x17c4   :  { %4242 = vmatmul.mubr.f32.vlgmr.msra.gmra.mrb[22].mxu0 %v3666_v11 }
0x1897   :  { %v4243_v13 = vpop.f32.mrb[22].mxu0 }
0x1898   :  { %v3762_v14 = vadd.f32 %v4243_v13, %v3868_v12  ;;  %v3756_v15 = vpop.f32.mrb[23].mxu0 }
0x1899   :  { %v3757_v16 = vadd.f32 %v3868_v12, %v3756_v15 }
0x189a   :  { %v3766_v17 = vadd.f32 %v3762_v14, %v4895_v7 }
0x189b   :  { %v3765_v18 = vadd.f32 %v3757_v16, %v4897_v8 }
0x189c   :  { %3768 = vst.msk [vmem:[#allocation2 + $0x8] sm:$0xff] %vm49_vm0, %v3766_v17 }
0x189d   :  { %3767 = vst.msk [vmem:[#allocation2] sm:$0xff] %vm49_vm0, %v3765_v18 }
0x189e   :  { %4419 = shalt.err (!%p4416_p4)
}
0x189f   :  { %s4420_s18 = scalar_lea.hbm %s5020_s13, 256 }
0x18a0   :  { %p4421_p5 = scmp.ne.s32.totalorder %s5020_s13, %s4420_s18  ;;  %p4424_p6 = scmp.lt.u32.totalorder %s4420_s18, %s5020_s13 }
0x18a2   :  { %p4426_p7 = pnand %p4424_p6, %p4421_p5 }
0x18a4   :  { %4429 = shalt.err (!%p4426_p7)
}
0x18a5   :  { %s4458_s21 = smov 128   ;;  %s4459_s3 = smov 8  }
0x18a6   :  { %3780 = dma.vmem_to_hbm [thread:$0]  %s3775_s16, 256, %s5020_s13, [#allocation3], %s4458_s21, %s4458_s21, %s4459_s3  }
0x18a7   :  { %4430 = dma.done.wait [#allocation3], 256  }
0x18a8   :  { %4431 = vsyncadd [#allocation3], 4294967040 }
0x18a9   :  { %3784 = vsyncpa [#allocation3], 1 }

</bundles_post_ra>
